<compile_context>
chip_gen: v7x
topology: tpu7x:2x2x1
jax: 0.10.0
libtpu: 0.0.40
codegen_flags: <defaults>
</compile_context>

<pallas_src>
import math
import jax
import jax.numpy as jnp
from jax.experimental import pallas as pl
from jax.experimental.pallas import tpu as pltpu

SEQ = 100          # sequence length (CustomGRU2 hard-codes the 100x100 path)
D = 100            # embed_dim == hidden_dim (required for torch.mm to be valid)
VOCAB = 64         # source vocab size
DP = 128           # lane/sublane-native padded size for D and SEQ


# --------------------------------------------------------------------------- #
# Kernel: fused CustomGRU2 step in transposed layout.
# --------------------------------------------------------------------------- #
def _encoder_gru_kernel(factT_ref, cT_ref, waT_ref, wbT_ref, bias_ref,
                        out_ref, a_scr, b_scr):
    dp = out_ref.shape[0]                                      # 128

    # Two stacked gate matmuls; wide (128, 384) weight is the stationary RHS.
    # Results go straight to VMEM scratch so ~48 vregs/product are not held live.
    a_scr[...] = jnp.dot(factT_ref[...], waT_ref[...],
                         preferred_element_type=jnp.float32)   # (128,384): [upd|res|hid] fact side
    b_scr[...] = jnp.dot(cT_ref[...], wbT_ref[...],
                         preferred_element_type=jnp.float32)   # (128,384): [upd|res|hid] hidden side

    cT = cT_ref[...]                                           # (128,128)

    # In transposed layout the (100,)-vector biases become per-sublane columns.
    zT = jax.nn.sigmoid(a_scr[:, 0:dp] + b_scr[:, 0:dp] + bias_ref[:, 0:1])
    rT = jax.nn.sigmoid(a_scr[:, dp:2 * dp] + b_scr[:, dp:2 * dp] + bias_ref[:, 1:2])
    hT = jnp.tanh(a_scr[:, 2 * dp:3 * dp]
                  + rT * b_scr[:, 2 * dp:3 * dp]
                  + bias_ref[:, 2:3])

    out_ref[...] = zT * cT + (1.0 - zT) * hT                   # (z*C + (1-z)*h)^T


# --------------------------------------------------------------------------- #
# Host-side packing / wrapper.
# --------------------------------------------------------------------------- #
def _pad_to(x, rows, cols):
    r, c = x.shape
    return jnp.pad(x, ((0, rows - r), (0, cols - c)))


def pack_params(params):
    """One-time host-side transpose + zero-pad + stacking of weights."""
    def wT(name):
        return _pad_to(params[name].astype(jnp.float32).T, DP, DP)

    waT = jnp.concatenate([wT("W_mem_upd_in"), wT("W_mem_res_in"),
                           wT("W_mem_hid_in")], axis=1)        # (128, 384) fact side
    wbT = jnp.concatenate([wT("W_mem_upd_hid"), wT("W_mem_res_hid"),
                           wT("W_mem_hid_hid")], axis=1)       # (128, 384) hidden side

    def bcol(name):
        b = params[name].astype(jnp.float32).reshape(-1)       # (100,)
        return jnp.pad(b, (0, DP - b.shape[0])).reshape(DP, 1)

    biasT = jnp.concatenate([bcol("b_mem_upd"), bcol("b_mem_res"),
                             bcol("b_mem_hid"),
                             jnp.zeros((DP, 5), jnp.float32)], axis=1)   # (128, 8)

    return {"embed": params["embed"].astype(jnp.float32),
            "waT": waT, "wbT": wbT, "biasT": biasT}


def _pallas_gru(factT, cT, waT, wbT, biasT):
    operands = (factT, cT, waT, wbT, biasT)
    out_bytes = DP * DP * 4
    bytes_accessed = out_bytes + sum(int(x.size) * x.dtype.itemsize for x in operands)
    cost = pl.CostEstimate(
        flops=2 * 2 * DP * DP * (3 * DP),        # two (128,128)@(128,384) matmuls
        transcendentals=3 * DP * DP,             # two sigmoids + one tanh
        bytes_accessed=int(bytes_accessed),
    )
    vmem = pl.BlockSpec(memory_space=pltpu.MemorySpace.VMEM)
    return pl.pallas_call(
        _encoder_gru_kernel,
        out_shape=jax.ShapeDtypeStruct((DP, DP), jnp.float32),
        in_specs=[vmem] * len(operands),
        out_specs=vmem,
        scratch_shapes=[pltpu.VMEM((DP, 3 * DP), jnp.float32),
                        pltpu.VMEM((DP, 3 * DP), jnp.float32)],
        cost_estimate=cost,
    )(*operands)


@jax.jit
def encoder_forward(source, hidden, packed):
    """source: (1, SEQ) int32, hidden: (1, D, D) f32 -> (None, (D, D) f32)."""
    # nn.Embedding lookup stays in XLA (gather), fused into the jitted wrapper.
    fact = jnp.take(packed["embed"], source[0].astype(jnp.int32), axis=0)   # (SEQ, D)
    # TODO(synk): nn.Dropout is identity in eval mode; train-mode dropout omitted.
    factT = _pad_to(fact.T, DP, DP)            # transposed layout for wide-RHS matmuls
    cT = _pad_to(hidden[0].T, DP, DP)          # torch: hidden.squeeze(0), transposed

    outT = _pallas_gru(factT, cT, packed["waT"], packed["wbT"], packed["biasT"])

    encoder_out = None
    encoder_hidden = outT[:D, :D].T            # back to the original orientation
    return encoder_out, encoder_hidden


# --------------------------------------------------------------------------- #
# Synthetic init + pure-JAX reference.
# --------------------------------------------------------------------------- #
def init_params(key):
    """Deterministic synthetic parameter init (shapes from the module __init__)."""
    ks = jax.random.split(key, 10)
    stdv = 1.0 / math.sqrt(D)

    def u(k, shape):
        return jax.random.uniform(k, shape, jnp.float32, minval=-stdv, maxval=stdv)

    return {
        "embed":         u(ks[0], (VOCAB, D)),   # nn.Embedding(source_vocab_size, embed_dim)
        "W_mem_res_in":  u(ks[1], (D, D)),
        "W_mem_res_hid": u(ks[2], (D, D)),
        "b_mem_res":     u(ks[3], (1, D)),
        "W_mem_upd_in":  u(ks[4], (D, D)),
        "W_mem_upd_hid": u(ks[5], (D, D)),
        "b_mem_upd":     u(ks[6], (1, D)),
        "W_mem_hid_in":  u(ks[7], (D, D)),
        "W_mem_hid_hid": u(ks[8], (D, D)),
        "b_mem_hid":     u(ks[9], (1, D)),
    }


def reference_forward(source, hidden, params):
    """Pure-JAX reference mirroring the PyTorch ops (for correctness check)."""
    fact = jnp.take(params["embed"], source[0], axis=0)                # (S, D)
    C = hidden[0]
    z = jax.nn.sigmoid(params["W_mem_upd_in"] @ fact + params["W_mem_upd_hid"] @ C
                       + params["b_mem_upd"])
    r = jax.nn.sigmoid(params["W_mem_res_in"] @ fact + params["W_mem_res_hid"] @ C
                       + params["b_mem_res"])
    h_ = jnp.tanh(params["W_mem_hid_in"] @ fact
                  + r * (params["W_mem_hid_hid"] @ C) + params["b_mem_hid"])
    return z * C + (1.0 - z) * h_


if __name__ == "__main__":
    key = jax.random.PRNGKey(0)
    k_p, k_src, k_hid = jax.random.split(key, 3)

    params = init_params(k_p)
    packed = pack_params(params)
    source = jax.random.randint(k_src, (1, SEQ), 0, VOCAB, dtype=jnp.int32)
    hidden = 0.1 * jax.random.normal(k_hid, (1, D, D), dtype=jnp.float32)

    encoder_out, encoder_hidden = encoder_forward(source, hidden, packed)
    encoder_hidden = jax.block_until_ready(encoder_hidden)

    ref = reference_forward(source, hidden, params)
    assert encoder_out is None
    assert encoder_hidden.shape == (D, D)
    assert jnp.allclose(encoder_hidden, ref, atol=1e-5, rtol=1e-5)

    print("KERNEL_OK")
</pallas_src>

<mosaic_0001>
module attributes {stable_mosaic.version = 11 : i64} {
  func.func @_encoder_gru_kernel(%arg0: memref<128x128xf32, #tpu.memory_space<vmem>>, %arg1: memref<128x128xf32, #tpu.memory_space<vmem>>, %arg2: memref<128x384xf32, #tpu.memory_space<vmem>>, %arg3: memref<128x384xf32, #tpu.memory_space<vmem>>, %arg4: memref<128x8xf32, #tpu.memory_space<vmem>>, %arg5: memref<128x128xf32, #tpu.memory_space<vmem>>, %arg6: memref<128x384xf32, #tpu.memory_space<vmem>>, %arg7: memref<128x384xf32, #tpu.memory_space<vmem>>) attributes {dimension_semantics = [], scalar_prefetch = 0 : i64, scratch_operands = 2 : i64, tpu.core_type = #tpu.core_type<tc>} {
    %c0 = arith.constant 0 : index
    %c0_0 = arith.constant 0 : index
    %0 = vector.load %arg0[%c0, %c0_0] : memref<128x128xf32, #tpu.memory_space<vmem>>, vector<128x128xf32>
    %c0_1 = arith.constant 0 : index
    %c0_2 = arith.constant 0 : index
    %1 = vector.load %arg2[%c0_1, %c0_2] : memref<128x384xf32, #tpu.memory_space<vmem>>, vector<128x384xf32>
    %cst = arith.constant dense<0.000000e+00> : vector<128x384xf32>
    %2 = tpu.matmul %0, %1, %cst {dimension_numbers = #tpu.dot_dimension_numbers<[1], [0], [0], [1], [0, 0, 1, 1], [], []>} : vector<128x128xf32>, vector<128x384xf32>, vector<128x384xf32> -> vector<128x384xf32>
    %c0_3 = arith.constant 0 : index
    %c0_4 = arith.constant 0 : index
    %3 = vector.load %arg6[%c0_3, %c0_4] : memref<128x384xf32, #tpu.memory_space<vmem>>, vector<128x384xf32>
    tpu.vector_store %arg6[%c0_3, %c0_4], %2 {strides = array<i32>} : memref<128x384xf32, #tpu.memory_space<vmem>>, vector<128x384xf32>,
    %c0_5 = arith.constant 0 : index
    %c0_6 = arith.constant 0 : index
    %4 = vector.load %arg1[%c0_5, %c0_6] : memref<128x128xf32, #tpu.memory_space<vmem>>, vector<128x128xf32>
    %c0_7 = arith.constant 0 : index
    %c0_8 = arith.constant 0 : index
    %5 = vector.load %arg3[%c0_7, %c0_8] : memref<128x384xf32, #tpu.memory_space<vmem>>, vector<128x384xf32>
    %cst_9 = arith.constant dense<0.000000e+00> : vector<128x384xf32>
    %6 = tpu.matmul %4, %5, %cst_9 {dimension_numbers = #tpu.dot_dimension_numbers<[1], [0], [0], [1], [0, 0, 1, 1], [], []>} : vector<128x128xf32>, vector<128x384xf32>, vector<128x384xf32> -> vector<128x384xf32>
    %c0_10 = arith.constant 0 : index
    %c0_11 = arith.constant 0 : index
    %7 = vector.load %arg7[%c0_10, %c0_11] : memref<128x384xf32, #tpu.memory_space<vmem>>, vector<128x384xf32>
    tpu.vector_store %arg7[%c0_10, %c0_11], %6 {strides = array<i32>} : memref<128x384xf32, #tpu.memory_space<vmem>>, vector<128x384xf32>,
    %c0_12 = arith.constant 0 : index
    %c0_13 = arith.constant 0 : index
    %8 = vector.load %arg1[%c0_12, %c0_13] : memref<128x128xf32, #tpu.memory_space<vmem>>, vector<128x128xf32>
    %c0_14 = arith.constant 0 : index
    %c0_15 = arith.constant 0 : index
    %9 = vector.load %arg6[%c0_14, %c0_15] : memref<128x384xf32, #tpu.memory_space<vmem>>, vector<128x128xf32>
    %c0_16 = arith.constant 0 : index
    %c0_17 = arith.constant 0 : index
    %10 = vector.load %arg7[%c0_16, %c0_17] : memref<128x384xf32, #tpu.memory_space<vmem>>, vector<128x128xf32>
    %11 = arith.addf %9, %10 : vector<128x128xf32>
    %c0_18 = arith.constant 0 : index
    %c0_19 = arith.constant 0 : index
    %12 = vector.load %arg4[%c0_18, %c0_19] : memref<128x8xf32, #tpu.memory_space<vmem>>, vector<128x1xf32>
    %13 = vector.broadcast %12 : vector<128x1xf32> to vector<128x128xf32>
    %14 = arith.addf %11, %13 : vector<128x128xf32>
    %15 = arith.negf %14 : vector<128x128xf32>
    %16 = math.exp %15 : vector<128x128xf32>
    %cst_20 = arith.constant 1.000000e+00 : f32
    %17 = vector.broadcast %cst_20 : f32 to vector<128x128xf32>
    %18 = arith.addf %17, %16 : vector<128x128xf32>
    %19 = arith.divf %17, %18 : vector<128x128xf32>
    %c0_21 = arith.constant 0 : index
    %c128 = arith.constant 128 : index
    %20 = vector.load %arg6[%c0_21, %c128] : memref<128x384xf32, #tpu.memory_space<vmem>>, vector<128x128xf32>
    %c0_22 = arith.constant 0 : index
    %c128_23 = arith.constant 128 : index
    %21 = vector.load %arg7[%c0_22, %c128_23] : memref<128x384xf32, #tpu.memory_space<vmem>>, vector<128x128xf32>
    %22 = arith.addf %20, %21 : vector<128x128xf32>
    %c0_24 = arith.constant 0 : index
    %c1 = arith.constant 1 : index
    %23 = vector.load %arg4[%c0_24, %c1] : memref<128x8xf32, #tpu.memory_space<vmem>>, vector<128x1xf32>
    %24 = vector.broadcast %23 : vector<128x1xf32> to vector<128x128xf32>
    %25 = arith.addf %22, %24 : vector<128x128xf32>
    %26 = arith.negf %25 : vector<128x128xf32>
    %27 = math.exp %26 : vector<128x128xf32>
    %cst_25 = arith.constant 1.000000e+00 : f32
    %28 = vector.broadcast %cst_25 : f32 to vector<128x128xf32>
    %29 = arith.addf %28, %27 : vector<128x128xf32>
    %30 = arith.divf %28, %29 : vector<128x128xf32>
    %c0_26 = arith.constant 0 : index
    %c256 = arith.constant 256 : index
    %31 = vector.load %arg6[%c0_26, %c256] : memref<128x384xf32, #tpu.memory_space<vmem>>, vector<128x128xf32>
    %c0_27 = arith.constant 0 : index
    %c256_28 = arith.constant 256 : index
    %32 = vector.load %arg7[%c0_27, %c256_28] : memref<128x384xf32, #tpu.memory_space<vmem>>, vector<128x128xf32>
    %33 = arith.mulf %30, %32 : vector<128x128xf32>
    %34 = arith.addf %31, %33 : vector<128x128xf32>
    %c0_29 = arith.constant 0 : index
    %c2 = arith.constant 2 : index
    %35 = vector.load %arg4[%c0_29, %c2] : memref<128x8xf32, #tpu.memory_space<vmem>>, vector<128x1xf32>
    %36 = vector.broadcast %35 : vector<128x1xf32> to vector<128x128xf32>
    %37 = arith.addf %34, %36 : vector<128x128xf32>
    %38 = math.tanh %37 : vector<128x128xf32>
    %39 = arith.mulf %19, %8 : vector<128x128xf32>
    %cst_30 = arith.constant 1.000000e+00 : f32
    %40 = vector.broadcast %cst_30 : f32 to vector<128x128xf32>
    %41 = arith.subf %40, %19 : vector<128x128xf32>
    %42 = arith.mulf %41, %38 : vector<128x128xf32>
    %43 = arith.addf %39, %42 : vector<128x128xf32>
    %c0_31 = arith.constant 0 : index
    %c0_32 = arith.constant 0 : index
    %44 = vector.load %arg5[%c0_31, %c0_32] : memref<128x128xf32, #tpu.memory_space<vmem>>, vector<128x128xf32>
    tpu.vector_store %arg5[%c0_31, %c0_32], %43 {strides = array<i32>} : memref<128x128xf32, #tpu.memory_space<vmem>>, vector<128x128xf32>,
    return
  }
}

</mosaic_0001>

<bundles_post_ra>
// kernel: encoder_forward.1
= control target key start
LH: loop header
LB: loop body
LE: loop exit
PB: predicated region body
PF: predicated region fallthrough
CT: control target
= control target key end

     0   :  { %v2159_v3 = vmov 0.0   ;;  %v2160_v8 = vmov 0   ;;  %s3156_s2 = inlined_call_operand.vmem [shape: f32[128,384], index: 2, kind: input, shape index: {}]   ;;  %s3157_s3 = inlined_call_operand.vmem [shape: f32[128,384], index: 3, kind: input, shape index: {}]   ;;  %s3158_s0 = inlined_call_operand.vmem [shape: f32[128,128], index: 0, kind: input, shape index: {}]   ;;  %s3159_s4 = inlined_call_operand.vmem [shape: f32[128,8], index: 4, kind: input, shape index: {}]   ;;  %s3160_s1 = inlined_call_operand.vmem [shape: f32[128,128], index: 1, kind: input, shape index: {}]   ;;  %s3161_s5 = inlined_call_operand.vmem [shape: f32[128,128], index: 5, kind: output, shape index: {}]  }
   0x1   :  { %v37_v0 = vld [vmem:[%s3156_s2 + $0x8] sm:$0xff]  ;;  %v40_v1 = vld [vmem:[%s3156_s2 + $0x20] sm:$0xff]  ;;  %148 = vmatprep.mubr.f32.mxu0 %v2159_v3  ;;  %196 = vmatprep.mubr.f32.mxu1 %v2159_v3  ;;  %v39_v5 = vld [vmem:[%s3156_s2 + $0x18] sm:$0xff] }
   0x2   :  { %v36_v2 = vld [vmem:[%s3156_s2] sm:$0xff]  ;;  %v1804_v4 = vpack.c.bf16 %v40_v1, %v37_v0  ;;  %v43_v6 = vld [vmem:[%s3156_s2 + $0x38] sm:$0xff]  ;;  %v46_v7 = vld [vmem:[%s3156_s2 + $0x50] sm:$0xff]  ;;  %1985 = vset.pattern.permute.xlu1 %v2160_v8  ;;  %1984 = vset.pattern.permute.xlu0 %v2160_v8 }
   0x3   :  { %v1806_v9 = vpack.c.bf16 %v39_v5, %v36_v2  ;;  %v1808_v10 = vpack.c.bf16 %v46_v7, %v43_v6  ;;  %v42_v11 = vld [vmem:[%s3156_s2 + $0x30] sm:$0xff]  ;;  %v45_v12 = vld [vmem:[%s3156_s2 + $0x48] sm:$0xff]  ;;  %v52_v14 = vld [vmem:[%s3156_s2 + $0x80] sm:$0xff] }
   0x4   :  { %v49_v13 = vld [vmem:[%s3156_s2 + $0x68] sm:$0xff]  ;;  %1805 = vmatprep.subr.bf16.mxu0 %v1804_v4  ;;  %1932 = vmatprep.subr.bf16.mxu1 %v1804_v4  ;;  %v1810_v15 = vpack.c.bf16 %v45_v12, %v42_v11  ;;  %v48_v17 = vld [vmem:[%s3156_s2 + $0x60] sm:$0xff]  ;;  %v51_v18 = vld [vmem:[%s3156_s2 + $0x78] sm:$0xff] }
   0x5   :  { %1807 = vmatpush1.bf16.msra.mxu0 %v1806_v9  ;;  %1940 = vmatpush1.bf16.msra.mxu1 %v1806_v9  ;;  %v1812_v16 = vpack.c.bf16 %v52_v14, %v49_v13  ;;  %v55_v19 = vld [vmem:[%s3156_s2 + $0x98] sm:$0xff]  ;;  %v58_v20 = vld [vmem:[%s3156_s2 + $0xb0] sm:$0xff]  ;;  %v1814_v21 = vpack.c.bf16 %v51_v18, %v48_v17  ;;  %v57_v24 = vld [vmem:[%s3156_s2 + $0xa8] sm:$0xff] }
   0x6   :  { %1809 = vmatprep.subr.bf16.mxu0 %v1808_v10  ;;  %1933 = vmatprep.subr.bf16.mxu1 %v1808_v10  ;;  %v1816_v22 = vpack.c.bf16 %v58_v20, %v55_v19  ;;  %v54_v23 = vld [vmem:[%s3156_s2 + $0x90] sm:$0xff]  ;;  %v61_v25 = vld [vmem:[%s3156_s2 + $0xc8] sm:$0xff]  ;;  %v64_v26 = vld [vmem:[%s3156_s2 + $0xe0] sm:$0xff] }
   0x7   :  { %v1818_v27 = vpack.c.bf16 %v57_v24, %v54_v23  ;;  %v1820_v28 = vpack.c.bf16 %v64_v26, %v61_v25  ;;  %v60_v29 = vld [vmem:[%s3156_s2 + $0xc0] sm:$0xff]  ;;  %v63_v30 = vld [vmem:[%s3156_s2 + $0xd8] sm:$0xff]  ;;  %v70_v32 = vld [vmem:[%s3156_s2 + $0x110] sm:$0xff] }
   0x8   :  { %v67_v31 = vld [vmem:[%s3156_s2 + $0xf8] sm:$0xff]  ;;  %v1822_v33 = vpack.c.bf16 %v63_v30, %v60_v29  ;;  %v66_v35 = vld [vmem:[%s3156_s2 + $0xf0] sm:$0xff]  ;;  %v69_v36 = vld [vmem:[%s3156_s2 + $0x108] sm:$0xff] }
   0x9   :  { %1811 = vmatpush1.bf16.msra.mxu0 %v1810_v15  ;;  %1941 = vmatpush1.bf16.msra.mxu1 %v1810_v15  ;;  %v1824_v34 = vpack.c.bf16 %v70_v32, %v67_v31  ;;  %v73_v37 = vld [vmem:[%s3156_s2 + $0x128] sm:$0xff]  ;;  %v76_v38 = vld [vmem:[%s3156_s2 + $0x140] sm:$0xff]  ;;  %v1826_v39 = vpack.c.bf16 %v69_v36, %v66_v35  ;;  %v75_v42 = vld [vmem:[%s3156_s2 + $0x138] sm:$0xff] }
   0xa   :  { %1813 = vmatprep.subr.bf16.mxu0 %v1812_v16  ;;  %1934 = vmatprep.subr.bf16.mxu1 %v1812_v16  ;;  %v1828_v40 = vpack.c.bf16 %v76_v38, %v73_v37  ;;  %v72_v41 = vld [vmem:[%s3156_s2 + $0x120] sm:$0xff]  ;;  %v79_v43 = vld [vmem:[%s3156_s2 + $0x158] sm:$0xff]  ;;  %v82_v44 = vld [vmem:[%s3156_s2 + $0x170] sm:$0xff] }
   0xb   :  { %v1830_v45 = vpack.c.bf16 %v75_v42, %v72_v41  ;;  %v1832_v46 = vpack.c.bf16 %v82_v44, %v79_v43  ;;  %v78_v47 = vld [vmem:[%s3156_s2 + $0x150] sm:$0xff]  ;;  %v81_v48 = vld [vmem:[%s3156_s2 + $0x168] sm:$0xff]  ;;  %v458_v52 = vld [vmem:[%s3157_s3 + $0x20] sm:$0xff] }
   0xc   :  { %v38_v49 = vld [vmem:[%s3156_s2 + $0x10] sm:$0xff]  ;;  %v41_v50 = vld [vmem:[%s3156_s2 + $0x28] sm:$0xff]  ;;  %v1834_v53 = vpack.c.bf16 %v81_v48, %v78_v47  ;;  %v454_v56 = vld [vmem:[%s3157_s3] sm:$0xff] }
   0xd   :  { %1815 = vmatpush1.bf16.msra.mxu0 %v1814_v21  ;;  %1942 = vmatpush1.bf16.msra.mxu1 %v1814_v21  ;;  %v455_v51 = vld [vmem:[%s3157_s3 + $0x8] sm:$0xff]  ;;  %v1836_v54 = vpack.c.bf16 %v41_v50, %v38_v49  ;;  %v457_v57 = vld [vmem:[%s3157_s3 + $0x18] sm:$0xff]  ;;  %v44_v58 = vld [vmem:[%s3156_s2 + $0x40] sm:$0xff] }
   0xe   :  { %1817 = vmatprep.subr.bf16.mxu0 %v1816_v22  ;;  %1935 = vmatprep.subr.bf16.mxu1 %v1816_v22  ;;  %v1868_v55 = vpack.c.bf16 %v458_v52, %v455_v51  ;;  %v47_v59 = vld [vmem:[%s3156_s2 + $0x58] sm:$0xff]  ;;  %v464_v61 = vld [vmem:[%s3157_s3 + $0x50] sm:$0xff]  ;;  %v2324_v62 = vld [vmem:[%s3158_s0] sm:$0xff]  ;;  %v1870_v0 = vpack.c.bf16 %v457_v57, %v454_v56 }
   0xf   :  { %v461_v60 = vld [vmem:[%s3157_s3 + $0x38] sm:$0xff]  ;;  %v2329_v63 = vld [vmem:[%s3158_s0 + $0x40] sm:$0xff]  ;;  %v460_v1 = vld [vmem:[%s3157_s3 + $0x30] sm:$0xff]  ;;  %v1840_v4 = vpack.c.bf16 %v47_v59, %v44_v58 }
  0x10   :  { %v463_v2 = vld [vmem:[%s3157_s3 + $0x48] sm:$0xff]  ;;  %v1872_v5 = vpack.c.bf16 %v464_v61, %v461_v60  ;;  %v50_v6 = vld [vmem:[%s3156_s2 + $0x70] sm:$0xff]  ;;  %v470_v9 = vld [vmem:[%s3157_s3 + $0x80] sm:$0xff] }
  0x11   :  { %1819 = vmatpush1.bf16.msra.mxu0 %v1818_v27  ;;  %1943 = vmatpush1.bf16.msra.mxu1 %v1818_v27  ;;  %v53_v7 = vld [vmem:[%s3156_s2 + $0x88] sm:$0xff]  ;;  %v1874_v12 = vpack.c.bf16 %v463_v2, %v460_v1  ;;  %v466_v13 = vld [vmem:[%s3157_s3 + $0x60] sm:$0xff]  ;;  %v469_v14 = vld [vmem:[%s3157_s3 + $0x78] sm:$0xff] }
  0x12   :  { %1821 = vmatprep.subr.bf16.mxu0 %v1820_v28  ;;  %1936 = vmatprep.subr.bf16.mxu1 %v1820_v28  ;;  %v467_v8 = vld [vmem:[%s3157_s3 + $0x68] sm:$0xff]  ;;  %v1844_v15 = vpack.c.bf16 %v53_v7, %v50_v6  ;;  %v56_v17 = vld [vmem:[%s3156_s2 + $0xa0] sm:$0xff]  ;;  %v59_v18 = vld [vmem:[%s3156_s2 + $0xb8] sm:$0xff]  ;;  %v1878_v23 = vpack.c.bf16 %v469_v14, %v466_v13 }
  0x13   :  { %v2354_v10 = vld [vmem:[%s3158_s0 + $0x8] sm:$0xff]  ;;  %v1876_v16 = vpack.c.bf16 %v470_v9, %v467_v8  ;;  %v473_v19 = vld [vmem:[%s3157_s3 + $0x98] sm:$0xff]  ;;  %v476_v20 = vld [vmem:[%s3157_s3 + $0xb0] sm:$0xff]  ;;  %v1848_v26 = vpack.c.bf16 %v59_v18, %v56_v17 }
  0x14   :  { %v2359_v11 = vld [vmem:[%s3158_s0 + $0x48] sm:$0xff]  ;;  %v2386_v21 = vld [vmem:[%s3158_s0 + $0x10] sm:$0xff]  ;;  %v1880_v27 = vpack.c.bf16 %v476_v20, %v473_v19  ;;  %v482_v31 = vld [vmem:[%s3157_s3 + $0xe0] sm:$0xff] }
  0x15   :  { %1823 = vmatpush1.bf16.msra.mxu0 %v1822_v33  ;;  %1944 = vmatpush1.bf16.msra.mxu1 %v1822_v33  ;;  %v2391_v22 = vld [vmem:[%s3158_s0 + $0x50] sm:$0xff]  ;;  %v475_v25 = vld [vmem:[%s3157_s3 + $0xa8] sm:$0xff]  ;;  %v2418_v32 = vld [vmem:[%s3158_s0 + $0x18] sm:$0xff] }
  0x16   :  { %1825 = vmatprep.subr.bf16.mxu0 %v1824_v34  ;;  %1937 = vmatprep.subr.bf16.mxu1 %v1824_v34  ;;  %v472_v24 = vld [vmem:[%s3157_s3 + $0x90] sm:$0xff]  ;;  %v65_v29 = vld [vmem:[%s3156_s2 + $0xe8] sm:$0xff]  ;;  %v2423_v33 = vld [vmem:[%s3158_s0 + $0x58] sm:$0xff] }
  0x17   :  { %v62_v28 = vld [vmem:[%s3156_s2 + $0xd0] sm:$0xff]  ;;  %v479_v30 = vld [vmem:[%s3157_s3 + $0xc8] sm:$0xff]  ;;  %v1882_v34 = vpack.c.bf16 %v475_v25, %v472_v24  ;;  %v478_v35 = vld [vmem:[%s3157_s3 + $0xc0] sm:$0xff] }
  0x18   :  { %v481_v36 = vld [vmem:[%s3157_s3 + $0xd8] sm:$0xff]  ;;  %v1852_v37 = vpack.c.bf16 %v65_v29, %v62_v28  ;;  %v1884_v38 = vpack.c.bf16 %v482_v31, %v479_v30  ;;  %v488_v42 = vld [vmem:[%s3157_s3 + $0x110] sm:$0xff]  ;;  %v2450_v43 = vld [vmem:[%s3158_s0 + $0x20] sm:$0xff] }
  0x19   :  { %1827 = vmatpush1.bf16.msra.mxu0 %v1826_v39  ;;  %1945 = vmatpush1.bf16.msra.mxu1 %v1826_v39  ;;  %v68_v39 = vld [vmem:[%s3156_s2 + $0x100] sm:$0xff]  ;;  %v485_v41 = vld [vmem:[%s3157_s3 + $0xf8] sm:$0xff]  ;;  %v487_v47 = vld [vmem:[%s3157_s3 + $0x108] sm:$0xff] }
  0x1a   :  { %1829 = vmatprep.subr.bf16.mxu0 %v1828_v40  ;;  %1938 = vmatprep.subr.bf16.mxu1 %v1828_v40  ;;  %v71_v40 = vld [vmem:[%s3156_s2 + $0x118] sm:$0xff]  ;;  %v2455_v44 = vld [vmem:[%s3158_s0 + $0x60] sm:$0xff]  ;;  %v1888_v49 = vpack.c.bf16 %v488_v42, %v485_v41  ;;  %v74_v50 = vld [vmem:[%s3156_s2 + $0x130] sm:$0xff] }
  0x1b   :  { %v1856_v48 = vpack.c.bf16 %v71_v40, %v68_v39  ;;  %v77_v51 = vld [vmem:[%s3156_s2 + $0x148] sm:$0xff]  ;;  %v490_v57 = vld [vmem:[%s3157_s3 + $0x120] sm:$0xff]  ;;  %v493_v58 = vld [vmem:[%s3157_s3 + $0x138] sm:$0xff] }
  0x1c   :  { %v491_v52 = vld [vmem:[%s3157_s3 + $0x128] sm:$0xff]  ;;  %v1860_v59 = vpack.c.bf16 %v77_v51, %v74_v50  ;;  %v80_v61 = vld [vmem:[%s3156_s2 + $0x160] sm:$0xff]  ;;  %v497_v1 = vld [vmem:[%s3157_s3 + $0x158] sm:$0xff]  ;;  %v1894_v6 = vpack.c.bf16 %v493_v58, %v490_v57 }
  0x1d   :  { %1831 = vmatpush1.bf16.msra.mxu0 %v1830_v45  ;;  %1946 = vmatpush1.bf16.msra.mxu1 %v1830_v45  ;;  %v1886_v45 = vpack.c.bf16 %v481_v36, %v478_v35  ;;  %v500_v2 = vld [vmem:[%s3157_s3 + $0x170] sm:$0xff]  ;;  %v499_v8 = vld [vmem:[%s3157_s3 + $0x168] sm:$0xff]  ;;  %v462_v19 = vld [vmem:[%s3157_s3 + $0x40] sm:$0xff] }
  0x1e   :  { %1833 = vmatprep.subr.bf16.mxu0 %v1832_v46  ;;  %1939 = vmatprep.subr.bf16.mxu1 %v1832_v46  ;;  %v484_v46 = vld [vmem:[%s3157_s3 + $0xf0] sm:$0xff]  ;;  %v459_v14 = vld [vmem:[%s3157_s3 + $0x28] sm:$0xff]  ;;  %v465_v20 = vld [vmem:[%s3157_s3 + $0x58] sm:$0xff] }
  0x1f   :  { %v1890_v56 = vpack.c.bf16 %v487_v47, %v484_v46  ;;  %v496_v7 = vld [vmem:[%s3157_s3 + $0x150] sm:$0xff]  ;;  %v2565_v24 = vld [vmem:[%s3160_s1] sm:$0xff]  ;;  %v1904_v25 = vpack.c.bf16 %v465_v20, %v462_v19  ;;  %v2586_v28 = vld [vmem:[%s3159_s4 + $0x18] sm:$0xff] }
  0x20   :  { %v456_v13 = vld [vmem:[%s3157_s3 + $0x10] sm:$0xff]  ;;  %v1898_v17 = vpack.c.bf16 %v499_v8, %v496_v7  ;;  %v2592_v29 = vld [vmem:[%s3160_s1 + $0x8] sm:$0xff]  ;;  %v474_v30 = vld [vmem:[%s3157_s3 + $0xa0] sm:$0xff]  ;;  %v2162_v8 = vmov 2  }
  0x21   :  { %1835 = vmatpush1.bf16.msra.mxu0 %v1834_v53  ;;  %1947 = vmatpush1.bf16.msra.mxu1 %v1834_v53  ;;  %v494_v53 = vld [vmem:[%s3157_s3 + $0x140] sm:$0xff]  ;;  %v1900_v18 = vpack.c.bf16 %v459_v14, %v456_v13  ;;  %v477_v31 = vld [vmem:[%s3157_s3 + $0xb8] sm:$0xff]  ;;  %v2619_v35 = vld [vmem:[%s3160_s1 + $0x10] sm:$0xff] }
  0x22   :  { %1837 = vmatprep.subr.bf16.mxu1 %v1836_v54  ;;  %1869 = vmatprep.subr.bf16.mxu0 %v1868_v55  ;;  %v2487_v55 = vld [vmem:[%s3158_s0 + $0x68] sm:$0xff]  ;;  %v1892_v60 = vpack.c.bf16 %v494_v53, %v491_v52  ;;  %v480_v36 = vld [vmem:[%s3157_s3 + $0xd0] sm:$0xff]  ;;  %v2640_v39 = vld [vmem:[%s3159_s4 + $0x38] sm:$0xff] }
  0x23   :  { %v2646_v40 = vld [vmem:[%s3160_s1 + $0x18] sm:$0xff]  ;;  %v486_v42 = vld [vmem:[%s3157_s3 + $0x100] sm:$0xff]  ;;  %v2667_v46 = vld [vmem:[%s3159_s4 + $0x48] sm:$0xff] }
  0x24   :  { %149 = vmatmul.mubr.f32.vlgmr.msra.gmra.mrb[0].mxu0 %v2324_v62  ;;  %197 = vmatmul.mubr.f32.vlgmr.msra.gmra.mrb[0].mxu1 %v2329_v63  ;;  %v2673_v47 = vld [vmem:[%s3160_s1 + $0x20] sm:$0xff]  ;;  %v495_v50 = vld [vmem:[%s3157_s3 + $0x148] sm:$0xff]  ;;  %v2694_v51 = vld [vmem:[%s3159_s4 + $0x58] sm:$0xff] }
  0x25   :  { %1839 = vmatpush3.bf16.msra.mxu1 %v1836_v54  ;;  %1871 = vmatpush1.bf16.msra.mxu0 %v1870_v0  ;;  %v2482_v54 = vld [vmem:[%s3158_s0 + $0x28] sm:$0xff]  ;;  %v83_v0 = vld [vmem:[%s3156_s2 + $0x178] sm:$0xff]  ;;  %3165 = vst [vmem:[#allocation4_spill] sm:$0xff] %v2673_v47  ;;  %v498_v53 = vld [vmem:[%s3157_s3 + $0x160] sm:$0xff] }
  0x26   :  { %154 = vmatprep.mubr.f32.mxu0 %v2159_v3  ;;  %202 = vmatprep.mubr.f32.mxu1 %v2159_v3  ;;  %v1864_v9 = vpack.c.bf16 %v83_v0, %v80_v61  ;;  %v2700_v52 = vld [vmem:[%s3160_s1 + $0x28] sm:$0xff]  ;;  %v444_v57 = vld [vmem:[%s3160_s1 + $0x30] sm:$0xff]  ;;  %v2734_v58 = vld [vmem:[%s3159_s4 + $0x60] sm:$0xff]  ;;  %v2161_v61 = vmov 1  }
  0x27   :  { %1841 = vmatprep.subr.bf16.mxu1 %v1840_v4  ;;  %1873 = vmatprep.subr.bf16.mxu0 %v1872_v5  ;;  %v2519_v5 = vld [vmem:[%s3158_s0 + $0x70] sm:$0xff]  ;;  %3166 = vst [vmem:[#allocation5_spill] sm:$0xff] %v2700_v52  ;;  %v447_v0 = vld [vmem:[%s3160_s1 + $0x48] sm:$0xff]  ;;  %v453_v7 = vld [vmem:[%s3160_s1 + $0x78] sm:$0xff] }
  0x28   :  { %155 = vmatmul.mubr.f32.gmra.mrb[2].mxu0 %v2354_v10  ;;  %203 = vmatmul.mubr.f32.gmra.mrb[2].mxu1 %v2359_v11 }
  0x29   :  { %1843 = vmatpush3.bf16.msra.mxu1 %v1840_v4  ;;  %1875 = vmatpush1.bf16.msra.mxu0 %v1874_v12  ;;  %v2514_v4 = vld [vmem:[%s3158_s0 + $0x30] sm:$0xff]  ;;  %v1896_v12 = vpack.c.bf16 %v500_v2, %v497_v1  ;;  %v449_v2 = vld [vmem:[%s3160_s1 + $0x58] sm:$0xff] }
  0x2a   :  { %160 = vmatprep.mubr.f32.mxu0 %v2159_v3  ;;  %208 = vmatprep.mubr.f32.mxu1 %v2159_v3  ;;  %v448_v1 = vld [vmem:[%s3160_s1 + $0x50] sm:$0xff] }
  0x2b   :  { %1845 = vmatprep.subr.bf16.mxu1 %v1844_v15  ;;  %1877 = vmatprep.subr.bf16.mxu0 %v1876_v16  ;;  %v2545_v16 = vld [vmem:[%s3158_s0 + $0x78] sm:$0xff] }
  0x2c   :  { %161 = vmatmul.mubr.f32.gmra.mrb[4].mxu0 %v2386_v21  ;;  %209 = vmatmul.mubr.f32.gmra.mrb[4].mxu1 %v2391_v22 }
  0x2d   :  { %1847 = vmatpush3.bf16.msra.mxu1 %v1844_v15  ;;  %1879 = vmatpush1.bf16.msra.mxu0 %v1878_v23  ;;  %v2540_v15 = vld [vmem:[%s3158_s0 + $0x38] sm:$0xff]  ;;  %v2560_v23 = vld [vmem:[%s3159_s4 + $0x10] sm:$0xff] }
  0x2e   :  { %166 = vmatprep.mubr.f32.mxu0 %v2159_v3  ;;  %214 = vmatprep.mubr.f32.mxu1 %v2159_v3 }
  0x2f   :  { %1849 = vmatprep.subr.bf16.mxu1 %v1848_v26  ;;  %1881 = vmatprep.subr.bf16.mxu0 %v1880_v27  ;;  %v471_v27 = vld [vmem:[%s3157_s3 + $0x88] sm:$0xff] }
  0x30   :  { %167 = vmatmul.mubr.f32.gmra.mrb[6].mxu0 %v2418_v32  ;;  %215 = vmatmul.mubr.f32.gmra.mrb[6].mxu1 %v2423_v33 }
  0x31   :  { %1851 = vmatpush3.bf16.msra.mxu1 %v1848_v26  ;;  %1883 = vmatpush1.bf16.msra.mxu0 %v1882_v34  ;;  %v468_v26 = vld [vmem:[%s3157_s3 + $0x70] sm:$0xff]  ;;  %v2613_v34 = vld [vmem:[%s3159_s4 + $0x28] sm:$0xff] }
  0x32   :  { %172 = vmatprep.mubr.f32.mxu0 %v2159_v3  ;;  %220 = vmatprep.mubr.f32.mxu1 %v2159_v3 }
  0x33   :  { %1853 = vmatprep.subr.bf16.mxu1 %v1852_v37  ;;  %1885 = vmatprep.subr.bf16.mxu0 %v1884_v38  ;;  %v2635_v38 = vld [vmem:[%s3159_s4 + $0x20] sm:$0xff] }
  0x34   :  { %173 = vmatmul.mubr.f32.gmra.mrb[8].mxu0 %v2450_v43  ;;  %221 = vmatmul.mubr.f32.gmra.mrb[8].mxu1 %v2455_v44 }
  0x35   :  { %1855 = vmatpush3.bf16.msra.mxu1 %v1852_v37  ;;  %1887 = vmatpush1.bf16.msra.mxu0 %v1886_v45  ;;  %v483_v37 = vld [vmem:[%s3157_s3 + $0xe8] sm:$0xff]  ;;  %v2662_v45 = vld [vmem:[%s3159_s4 + $0x30] sm:$0xff] }
  0x36   :  { %178 = vmatprep.mubr.f32.mxu0 %v2159_v3  ;;  %226 = vmatprep.mubr.f32.mxu1 %v2159_v3  ;;  %v1916_v41 = vpack.c.bf16 %v483_v37, %v480_v36 }
  0x37   :  { %1857 = vmatprep.subr.bf16.mxu1 %v1856_v48  ;;  %1889 = vmatprep.subr.bf16.mxu0 %v1888_v49  ;;  %v492_v49 = vld [vmem:[%s3157_s3 + $0x130] sm:$0xff] }
  0x38   :  { %179 = vmatmul.mubr.f32.gmra.mrb[10].mxu0 %v2482_v54  ;;  %227 = vmatmul.mubr.f32.gmra.mrb[10].mxu1 %v2487_v55 }
  0x39   :  { %1859 = vmatpush3.bf16.msra.mxu1 %v1856_v48  ;;  %1891 = vmatpush1.bf16.msra.mxu0 %v1890_v56  ;;  %v2721_v56 = vld [vmem:[%s3159_s4 + $0x68] sm:$0xff] }
  0x3a   :  { %184 = vmatprep.mubr.f32.mxu0 %v2159_v3  ;;  %232 = vmatprep.mubr.f32.mxu1 %v2159_v3 }
  0x3b   :  { %1861 = vmatprep.subr.bf16.mxu1 %v1860_v59  ;;  %1893 = vmatprep.subr.bf16.mxu0 %v1892_v60  ;;  %v446_v60 = vld [vmem:[%s3160_s1 + $0x40] sm:$0xff] }
  0x3c   :  { %185 = vmatmul.mubr.f32.gmra.mrb[12].mxu0 %v2514_v4  ;;  %233 = vmatmul.mubr.f32.gmra.mrb[12].mxu1 %v2519_v5 }
  0x3d   :  { %1863 = vmatpush3.bf16.msra.mxu1 %v1860_v59  ;;  %1895 = vmatpush1.bf16.msra.mxu0 %v1894_v6  ;;  %v2745_v59 = vld [vmem:[%s3160_s1 + $0x38] sm:$0xff]  ;;  %v452_v6 = vld [vmem:[%s3160_s1 + $0x70] sm:$0xff] }
  0x3e   :  { %190 = vmatprep.mubr.f32.mxu0 %v2159_v3  ;;  %238 = vmatprep.mubr.f32.mxu1 %v2159_v3  ;;  %3167 = vst [vmem:[#allocation6_spill] sm:$0xff] %v2745_v59 }
  0x3f   :  { %1865 = vmatprep.subr.bf16.mxu1 %v1864_v9  ;;  %1897 = vmatprep.subr.bf16.mxu0 %v1896_v12 }
  0x40   :  { %191 = vmatmul.mubr.f32.gmra.mrb[14].mxu0 %v2540_v15  ;;  %239 = vmatmul.mubr.f32.gmra.mrb[14].mxu1 %v2545_v16 }
  0x41   :  { %1867 = vmatpush3.bf16.msra.mxu1 %v1864_v9  ;;  %1899 = vmatpush1.bf16.msra.mxu0 %v1898_v17 }
  0x42   :  { %1724 = vmatprep.mubr.f32.mxu1 %v2324_v62  ;;  %566 = vmatprep.mubr.f32.mxu0 %v2159_v3  ;;  %v2581_v62 = vld [vmem:[%s3159_s4] sm:$0xff] }
  0x43   :  { %1901 = vmatprep.subr.bf16.mxu1 %v1900_v18  ;;  %948 = vperm.xlu1 %1985, %v2560_v23  }
  0x44   :  { %1725 = vmatmul.mubr.f32.vlgmr.msra.gmra.mrb[16].mxu1 %v2354_v10  ;;  %567 = vmatmul.mubr.f32.vlgmr.msra.gmra.mrb[0].mxu0 %v2565_v24  ;;  %v1908_v10 = vpack.c.bf16 %v471_v27, %v468_v26 }
  0x45   :  { %1903 = vmatpush3.bf16.msra.mxu1 %v1900_v18  ;;  %1727 = vmatprep.mubr.f32.mxu1 %v2386_v21  ;;  %v2608_v21 = vld [vmem:[%s3159_s4 + $0x8] sm:$0xff] }
  0x46   :  { %572 = vmatprep.mubr.f32.mxu0 %v2159_v3  ;;  %1905 = vmatprep.subr.bf16.mxu1 %v1904_v25 }
  0x47   :  { %938 = vperm.xlu0 %1984, %v2581_v62   ;;  %953 = vperm.xlu1 %1985, %v2586_v28  }
  0x48   :  { %1728 = vmatmul.mubr.f32.gmra.mrb[18].mxu1 %v2418_v32  ;;  %573 = vmatmul.mubr.f32.gmra.mrb[2].mxu0 %v2592_v29  ;;  %v1912_v32 = vpack.c.bf16 %v477_v31, %v474_v30 }
  0x49   :  { %1907 = vmatpush3.bf16.msra.mxu1 %v1904_v25  ;;  %1730 = vmatprep.mubr.f32.mxu1 %v2450_v43  ;;  %v489_v43 = vld [vmem:[%s3157_s3 + $0x118] sm:$0xff] }
  0x4a   :  { %578 = vmatprep.mubr.f32.mxu0 %v2159_v3  ;;  %1909 = vmatprep.subr.bf16.mxu1 %v1908_v10  ;;  %v1920_v48 = vpack.c.bf16 %v489_v43, %v486_v42 }
  0x4b   :  { %943 = vperm.xlu0 %1984, %v2608_v21   ;;  %963 = vperm.xlu1 %1985, %v2613_v34  }
  0x4c   :  { %1731 = vmatmul.mubr.f32.gmra.mrb[20].mxu1 %v2482_v54  ;;  %579 = vmatmul.mubr.f32.gmra.mrb[4].mxu0 %v2619_v35  ;;  %v501_v54 = vld [vmem:[%s3157_s3 + $0x178] sm:$0xff] }
  0x4d   :  { %1911 = vmatpush3.bf16.msra.mxu1 %v1908_v10  ;;  %1733 = vmatprep.mubr.f32.mxu1 %v2514_v4  ;;  %v450_v4 = vld [vmem:[%s3160_s1 + $0x60] sm:$0xff] }
  0x4e   :  { %584 = vmatprep.mubr.f32.mxu0 %v2159_v3  ;;  %1913 = vmatprep.subr.bf16.mxu1 %v1912_v32 }
  0x4f   :  { %958 = vperm.xlu0 %1984, %v2635_v38   ;;  %973 = vperm.xlu1 %1985, %v2640_v39  }
  0x50   :  { %1734 = vmatmul.mubr.f32.gmra.mrb[22].mxu1 %v2540_v15  ;;  %585 = vmatmul.mubr.f32.gmra.mrb[6].mxu0 %v2646_v40 }
  0x51   :  { %1915 = vmatpush3.bf16.msra.mxu1 %v1912_v32  ;;  %1736 = vmatprep.mubr.f32.mxu1 %v2329_v63  ;;  %v2689_v63 = vld [vmem:[%s3159_s4 + $0x40] sm:$0xff] }
  0x52   :  { %590 = vmatprep.mubr.f32.mxu0 %v2159_v3  ;;  %1917 = vmatprep.subr.bf16.mxu1 %v1916_v41 }
  0x53   :  { %968 = vperm.xlu0 %1984, %v2662_v45   ;;  %983 = vperm.xlu1 %1985, %v2667_v46  }
  0x54   :  { %1737 = vmatmul.mubr.f32.gmra.mrb[24].mxu1 %v2359_v11  ;;  %591 = vmatmul.mubr.f32.gmra.mrb[8].mxu0 %v2673_v47  ;;  %v1924_v11 = vpack.c.bf16 %v495_v50, %v492_v49 }
  0x55   :  { %1919 = vmatpush3.bf16.msra.mxu1 %v1916_v41  ;;  %1739 = vmatprep.mubr.f32.mxu1 %v2391_v22  ;;  %v2716_v22 = vld [vmem:[%s3159_s4 + $0x50] sm:$0xff] }
  0x56   :  { %596 = vmatprep.mubr.f32.mxu0 %v2159_v3  ;;  %1921 = vmatprep.subr.bf16.mxu1 %v1920_v48 }
  0x57   :  { %978 = vperm.xlu0 %1984, %v2689_v63   ;;  %993 = vperm.xlu1 %1985, %v2694_v51  }
  0x58   :  { %1740 = vmatmul.mubr.f32.gmra.mrb[26].mxu1 %v2423_v33  ;;  %597 = vmatmul.mubr.f32.gmra.mrb[10].mxu0 %v2700_v52  ;;  %v1928_v33 = vpack.c.bf16 %v501_v54, %v498_v53 }
  0x59   :  { %1923 = vmatpush3.bf16.msra.mxu1 %v1920_v48  ;;  %1742 = vmatprep.mubr.f32.mxu1 %v2455_v44  ;;  %v2739_v44 = vld [vmem:[%s3159_s4 + $0x78] sm:$0xff] }
  0x5a   :  { %602 = vmatprep.mubr.f32.mxu0 %v2159_v3  ;;  %1925 = vmatprep.subr.bf16.mxu1 %v1924_v11 }
  0x5b   :  { %988 = vperm.xlu0 %1984, %v2716_v22   ;;  %1003 = vperm.xlu1 %1985, %v2721_v56  }
  0x5c   :  { %1743 = vmatmul.mubr.f32.gmra.mrb[28].mxu1 %v2487_v55  ;;  %603 = vmatmul.mubr.f32.gmra.mrb[12].mxu0 %v444_v57  ;;  %v2755_v55 = vld [vmem:[%s3159_s4 + $0x70] sm:$0xff] }
  0x5d   :  { %1927 = vmatpush3.bf16.msra.mxu1 %v1924_v11  ;;  %1745 = vmatprep.mubr.f32.mxu1 %v2519_v5  ;;  %v451_v5 = vld [vmem:[%s3160_s1 + $0x68] sm:$0xff] }
  0x5e   :  { %608 = vmatprep.mubr.f32.mxu0 %v2159_v3  ;;  %1929 = vmatprep.subr.bf16.mxu1 %v1928_v33 }
  0x5f   :  { %998 = vperm.xlu0 %1984, %v2734_v58   ;;  %1013 = vperm.xlu1 %1985, %v2739_v44  }
  0x60   :  { %1746 = vmatmul.mubr.f32.gmra.mrb[30].mxu1 %v2545_v16  ;;  %609 = vmatmul.mubr.f32.gmra.mrb[14].mxu0 %v2745_v59 }
  0x61   :  { %1931 = vmatpush3.bf16.msra.mxu1 %v1928_v33  ;;  %614 = vmatprep.mubr.f32.mxu0 %v2159_v3 }
  0x62   :  { %1780 = vmatprep.mubr.f32.mxu1 %v2565_v24 }
  0x63   :  { %1008 = vperm.xlu0 %1984, %v2755_v55   ;;  %1987 = vset.pattern.permute.xlu1 %v2161_v61 }
  0x64   :  { %615 = vmatmul.mubr.f32.gmra.mrb[16].mxu0 %v446_v60  ;;  %1781 = vmatmul.mubr.f32.vlgmr.msra.gmra.mrb[32].mxu1 %v2592_v29 }
  0x65   :  { %620 = vmatprep.mubr.f32.mxu0 %v2159_v3  ;;  %1783 = vmatprep.mubr.f32.mxu1 %v2619_v35 }
  0x66   :  { %1181 = vperm.xlu1 %1987, %v2608_v21  }
  0x67   :  { %1986 = vset.pattern.permute.xlu0 %v2161_v61 }
  0x68   :  { %621 = vmatmul.mubr.f32.gmra.mrb[18].mxu0 %v447_v0  ;;  %1784 = vmatmul.mubr.f32.gmra.mrb[34].mxu1 %v2646_v40 }
  0x69   :  { %626 = vmatprep.mubr.f32.mxu0 %v2159_v3  ;;  %1786 = vmatprep.mubr.f32.mxu1 %v2673_v47 }
  0x6a   :  { %1177 = vperm.xlu0 %1986, %v2581_v62   ;;  %1185 = vperm.xlu1 %1987, %v2560_v23  }
  0x6c   :  { %627 = vmatmul.mubr.f32.gmra.mrb[20].mxu0 %v448_v1  ;;  %1787 = vmatmul.mubr.f32.gmra.mrb[36].mxu1 %v2700_v52 }
  0x6d   :  { %632 = vmatprep.mubr.f32.mxu0 %v2159_v3  ;;  %1789 = vmatprep.mubr.f32.mxu1 %v444_v57 }
  0x6e   :  { %1193 = vperm.xlu1 %1987, %v2635_v38   ;;  %1189 = vperm.xlu0 %1986, %v2586_v28  }
  0x70   :  { %633 = vmatmul.mubr.f32.gmra.mrb[22].mxu0 %v449_v2  ;;  %1790 = vmatmul.mubr.f32.gmra.mrb[38].mxu1 %v2745_v59 }
  0x71   :  { %638 = vmatprep.mubr.f32.mxu0 %v2159_v3  ;;  %1792 = vmatprep.mubr.f32.mxu1 %v446_v60 }
  0x72   :  { %1201 = vperm.xlu1 %1987, %v2662_v45   ;;  %1197 = vperm.xlu0 %1986, %v2613_v34  }
  0x74   :  { %639 = vmatmul.mubr.f32.gmra.mrb[24].mxu0 %v450_v4  ;;  %1793 = vmatmul.mubr.f32.gmra.mrb[40].mxu1 %v447_v0 }
  0x75   :  { %644 = vmatprep.mubr.f32.mxu0 %v2159_v3  ;;  %1795 = vmatprep.mubr.f32.mxu1 %v448_v1 }
  0x76   :  { %1209 = vperm.xlu1 %1987, %v2689_v63   ;;  %1205 = vperm.xlu0 %1986, %v2640_v39  }
  0x78   :  { %645 = vmatmul.mubr.f32.gmra.mrb[26].mxu0 %v451_v5  ;;  %1796 = vmatmul.mubr.f32.gmra.mrb[42].mxu1 %v449_v2 }
  0x79   :  { %650 = vmatprep.mubr.f32.mxu0 %v2159_v3  ;;  %1798 = vmatprep.mubr.f32.mxu1 %v450_v4 }
  0x7a   :  { %1217 = vperm.xlu1 %1987, %v2716_v22   ;;  %1213 = vperm.xlu0 %1986, %v2667_v46  }
  0x7c   :  { %651 = vmatmul.mubr.f32.gmra.mrb[28].mxu0 %v452_v6  ;;  %1799 = vmatmul.mubr.f32.gmra.mrb[44].mxu1 %v451_v5 }
  0x7d   :  { %656 = vmatprep.mubr.f32.mxu0 %v2159_v3  ;;  %1801 = vmatprep.mubr.f32.mxu1 %v452_v6 }
  0x7e   :  { %1225 = vperm.xlu1 %1987, %v2734_v58   ;;  %1221 = vperm.xlu0 %1986, %v2694_v51  }
  0x80   :  { %657 = vmatmul.mubr.f32.gmra.mrb[30].mxu0 %v453_v7  ;;  %1802 = vmatmul.mubr.f32.gmra.mrb[46].mxu1 %v453_v7 }
  0x82   :  { %1233 = vperm.xlu1 %1987, %v2755_v55   ;;  %1229 = vperm.xlu0 %1986, %v2721_v56  }
  0x86   :  { %1988 = vset.pattern.permute.xlu1 %v2162_v8  ;;  %1237 = vperm.xlu0 %1986, %v2739_v44  }
  0x87   :  { %1417 = vperm.xlu1 %1988, %v2581_v62  }
  0x8a   :  { %1989 = vset.pattern.permute.xlu0 %v2162_v8 }
  0x8b   :  { %1425 = vperm.xlu1 %1988, %v2560_v23   ;;  %1421 = vperm.xlu0 %1989, %v2608_v21  }
  0x8f   :  { %1429 = vperm.xlu1 %1988, %v2586_v28   ;;  %1433 = vperm.xlu0 %1989, %v2635_v38  }
  0x93   :  { %1437 = vperm.xlu1 %1988, %v2613_v34   ;;  %1441 = vperm.xlu0 %1989, %v2662_v45  }
  0x97   :  { %1445 = vperm.xlu1 %1988, %v2640_v39   ;;  %1449 = vperm.xlu0 %1989, %v2689_v63  }
  0x9b   :  { %1453 = vperm.xlu1 %1988, %v2667_v46   ;;  %1457 = vperm.xlu0 %1989, %v2716_v22  }
  0x9f   :  { %1461 = vperm.xlu1 %1988, %v2694_v51   ;;  %1465 = vperm.xlu0 %1989, %v2734_v58  }
  0xa3   :  { %1469 = vperm.xlu1 %1988, %v2721_v56   ;;  %1473 = vperm.xlu0 %1989, %v2755_v55  }
  0xa7   :  { %1477 = vperm.xlu1 %1988, %v2739_v44  }
  0xc2   :  { %v949_v3 = vpop.permute.xlu1 %948 }
  0xc6   :  { %v2829_v9 = vpop.permute.xlu1 %953  ;;  %v939_v12 = vpop.permute.xlu0 %938 }
  0xca   :  { %v2831_v13 = vpop.permute.xlu1 %963  ;;  %v944_v14 = vpop.permute.xlu0 %943 }
  0xce   :  { %v2833_v15 = vpop.permute.xlu1 %973  ;;  %v2835_v16 = vpop.permute.xlu0 %958 }
  0xd2   :  { %v2837_v17 = vpop.permute.xlu1 %983  ;;  %v2839_v18 = vpop.permute.xlu0 %968 }
  0xd6   :  { %v2841_v19 = vpop.permute.xlu1 %993  ;;  %v2843_v20 = vpop.permute.xlu0 %978 }
  0xda   :  { %v2845_v23 = vpop.permute.xlu1 %1003  ;;  %v2847_v25 = vpop.permute.xlu0 %988 }
  0xde   :  { %v2849_v26 = vpop.permute.xlu1 %1013  ;;  %v2855_v28 = vpop.permute.xlu0 %998 }
  0xdf   :  { %3168 = vst [vmem:[#allocation7_spill] sm:$0xff] %v2849_v26 }
  0xe2   :  { %v2863_v34 = vpop.permute.xlu0 %1008 }
  0xe3   :  { %3169 = vst [vmem:[#allocation8_spill] sm:$0xff] %v2863_v34 }
  0xe5   :  { %v1182_v31 = vpop.permute.xlu1 %1181 }
  0xe9   :  { %v1186_v36 = vpop.permute.xlu1 %1185  ;;  %v1178_v39 = vpop.permute.xlu0 %1177 }
  0xed   :  { %v1194_v43 = vpop.permute.xlu1 %1193  ;;  %v1190_v45 = vpop.permute.xlu0 %1189 }
  0xf1   :  { %v2879_v49 = vpop.permute.xlu1 %1201  ;;  %v2883_v63 = vpop.permute.xlu0 %1197 }
  0xf5   :  { %v2891_v54 = vpop.permute.xlu1 %1209  ;;  %v2893_v22 = vpop.permute.xlu0 %1205 }
  0xf7   :  { %v2851_v27 = vpop.f32.mrb[0].mxu1 }
  0xf8   :  { %v2853_v62 = vpop.f32.mrb[1].mxu1 }
  0xf9   :  { %v2903_v6 = vpop.permute.xlu1 %1217  ;;  %v2905_v7 = vpop.permute.xlu0 %1213 }
  0xfb   :  { %v2857_v10 = vpop.f32.mrb[2].mxu1 }
  0xfc   :  { %v2859_v30 = vpop.f32.mrb[3].mxu1 }
  0xff   :  { %v2861_v21 = vpop.f32.mrb[4].mxu1 }
 0x100   :  { %v2865_v32 = vpop.f32.mrb[5].mxu1 }
 0x103   :  { %v2867_v37 = vpop.f32.mrb[6].mxu1 }
 0x104   :  { %v2869_v38 = vpop.f32.mrb[7].mxu1 }
 0x107   :  { %v2871_v41 = vpop.f32.mrb[8].mxu1 }
 0x108   :  { %v2873_v42 = vpop.f32.mrb[9].mxu1 }
 0x10b   :  { %v2875_v46 = vpop.f32.mrb[10].mxu1 }
 0x10c   :  { %v2877_v48 = vpop.f32.mrb[11].mxu1 }
 0x10f   :  { %v2881_v50 = vpop.f32.mrb[12].mxu1 }
 0x110   :  { %v2885_v51 = vpop.f32.mrb[13].mxu1 }
 0x113   :  { %v2887_v11 = vpop.f32.mrb[14].mxu1 }
 0x114   :  { %v2889_v53 = vpop.f32.mrb[15].mxu1 }
 0x115   :  { %3170 = vst [vmem:[#allocation9_spill] sm:$0xff] %v2889_v53 }
 0x117   :  { %v568_v56 = vpop.f32.mrb[0].mxu0  ;;  %v2895_v57 = vpop.f32.mrb[16].mxu1 }
 0x118   :  { %v570_v33 = vpop.f32.mrb[1].mxu0  ;;  %v2897_v58 = vpop.f32.mrb[17].mxu1  ;;  %v1016_v55 = vadd.f32 %v939_v12, %v568_v56 }
 0x119   :  { %v1240_v44 = vadd.f32 %v1178_v39, %v570_v33 }
 0x11a   :  { %v1596_v8 = vmul.f32 -1.442695, %v1016_v55 }
 0x11b   :  { %v1612_v60 = vmul.f32 -1.442695, %v1240_v44  ;;  %v574_v61 = vpop.f32.mrb[2].mxu0  ;;  %v2899_v0 = vpop.f32.mrb[18].mxu1 }
 0x11c   :  { %v1017_v1 = vadd.f32 %v944_v14, %v574_v61  ;;  %v576_v2 = vpop.f32.mrb[3].mxu0  ;;  %v2901_v4 = vpop.f32.mrb[19].mxu1 }
 0x11d   :  { %1990 = vpow2.f32 %v1612_v60  ;;  %v1241_v5 = vadd.f32 %v1182_v31, %v576_v2 }
 0x11e   :  { %v1597_v12 = vmul.f32 -1.442695, %v1017_v1 }
 0x11f   :  { %v1613_v26 = vmul.f32 -1.442695, %v1241_v5  ;;  %v580_v59 = vpop.f32.mrb[4].mxu0  ;;  %v2907_v34 = vpop.f32.mrb[20].mxu1 }
 0x120   :  { %v1018_v39 = vadd.f32 %v949_v3, %v580_v59  ;;  %v582_v56 = vpop.f32.mrb[5].mxu0  ;;  %v2909_v33 = vpop.f32.mrb[21].mxu1 }
 0x121   :  { %1992 = vpow2.f32 %v1613_v26  ;;  %v1242_v14 = vadd.f32 %v1186_v36, %v582_v56  ;;  %v2916_v3 = vpop.permute.xlu1 %1225  ;;  %v2918_v26 = vpop.permute.xlu0 %1221 }
 0x122   :  { %v1598_v44 = vmul.f32 -1.442695, %v1018_v39  ;;  %1994 = vpow2.f32 %v1596_v8 }
 0x123   :  { %v1614_v60 = vmul.f32 -1.442695, %v1242_v14  ;;  %v586_v31 = vpop.f32.mrb[6].mxu0  ;;  %v2911_v61 = vpop.f32.mrb[22].mxu1  ;;  %1996 = vpow2.f32 %v1597_v12 }
 0x124   :  { %v1019_v55 = vadd.f32 %v2829_v9, %v586_v31  ;;  %v588_v2 = vpop.f32.mrb[7].mxu0  ;;  %v2914_v5 = vpop.f32.mrb[23].mxu1 }
 0x125   :  { %1998 = vpow2.f32 %v1614_v60  ;;  %v1243_v1 = vadd.f32 %v1190_v45, %v588_v2 }
 0x126   :  { %2000 = vpow2.f32 %v1598_v44  ;;  %v1599_v59 = vmul.f32 -1.442695, %v1019_v55 }
 0x127   :  { %v1991_v36 = vpop.eup %1990  ;;  %v1615_v8 = vmul.f32 -1.442695, %v1243_v1  ;;  %v592_v39 = vpop.f32.mrb[8].mxu0 }
 0x128   :  { %v2920_v56 = vpop.f32.mrb[24].mxu1  ;;  %v1020_v12 = vadd.f32 %v2835_v16, %v592_v39  ;;  %v594_v14 = vpop.f32.mrb[9].mxu0  ;;  %v1304_v31 = vadd.f32 1.0, %v1991_v36  ;;  %2002 = vpow2.f32 %v1599_v59 }
 0x129   :  { %3171 = vst [vmem:[#allocation10_spill] sm:$0xff] %v2920_v56  ;;  %v2923_v9 = vpop.f32.mrb[25].mxu1  ;;  %v1244_v47 = vadd.f32 %v1194_v43, %v594_v14  ;;  %2004 = vpow2.f32 %v1615_v8  ;;  %v2931_v59 = vpop.permute.xlu1 %1233 }
 0x12a   :  { %3172 = vst [vmem:[#allocation11_spill] sm:$0xff] %v2923_v9  ;;  %v1600_v52 = vmul.f32 -1.442695, %v1020_v12  ;;  %2006 = vrcp.f32 %v1304_v31 }
 0x12b   :  { %v1993_v45 = vpop.eup %1992  ;;  %v1616_v44 = vmul.f32 -1.442695, %v1244_v47  ;;  %v598_v60 = vpop.f32.mrb[10].mxu0 }
 0x12c   :  { %v2925_v55 = vpop.f32.mrb[26].mxu1  ;;  %v1305_v2 = vadd.f32 1.0, %v1993_v45  ;;  %v1021_v1 = vadd.f32 %v2831_v13, %v598_v60  ;;  %v600_v53 = vpop.f32.mrb[11].mxu0 }
 0x12d   :  { %3173 = vst [vmem:[#allocation12_spill] sm:$0xff] %v2925_v55  ;;  %v2928_v56 = vpop.f32.mrb[27].mxu1  ;;  %v1995_v16 = vpop.eup %1994  ;;  %v1245_v39 = vadd.f32 %v2883_v63, %v600_v53 }
 0x12e   :  { %3174 = vst [vmem:[#allocation13_spill] sm:$0xff] %v2928_v56  ;;  %v1997_v36 = vpop.eup %1996  ;;  %2008 = vrcp.f32 %v1305_v2  ;;  %v1601_v43 = vmul.f32 -1.442695, %v1021_v1  ;;  %v2933_v47 = vpop.permute.xlu0 %1229  ;;  %v1080_v60 = vadd.f32 1.0, %v1995_v16 }
 0x12f   :  { %v1999_v8 = vpop.eup %1998  ;;  %2010 = vpow2.f32 %v1616_v44  ;;  %v1617_v14 = vmul.f32 -1.442695, %v1245_v39  ;;  %v604_v12 = vpop.f32.mrb[12].mxu0  ;;  %v1081_v63 = vadd.f32 1.0, %v1997_v36 }
 0x130   :  { %v2935_v45 = vpop.f32.mrb[28].mxu1  ;;  %v2001_v13 = vpop.eup %2000  ;;  %v1306_v55 = vadd.f32 1.0, %v1999_v8  ;;  %2012 = vpow2.f32 %v1600_v52  ;;  %v1022_v53 = vadd.f32 %v2839_v18, %v604_v12 }
 0x131   :  { %3175 = vst [vmem:[#allocation14_spill] sm:$0xff] %v2935_v45  ;;  %v606_v31 = vpop.f32.mrb[13].mxu0  ;;  %v2937_v56 = vpop.f32.mrb[29].mxu1  ;;  %2014 = vpow2.f32 %v1601_v43  ;;  %v1082_v1 = vadd.f32 1.0, %v2001_v13 }
 0x132   :  { %3176 = vst [vmem:[#allocation15_spill] sm:$0xff] %v2937_v56  ;;  %v1246_v2 = vadd.f32 %v2879_v49, %v606_v31  ;;  %2016 = vrcp.f32 %v1306_v55  ;;  %v2003_v45 = vpop.eup %2002  ;;  %v1602_v43 = vmul.f32 -1.442695, %v1022_v53  ;;  %v2947_v12 = vpop.permute.xlu0 %1237 }
 0x133   :  { %2018 = vpow2.f32 %v1617_v14  ;;  %v610_v39 = vpop.f32.mrb[14].mxu0  ;;  %v2941_v9 = vpop.f32.mrb[30].mxu1  ;;  %3179 = vst [vmem:[#allocation18_spill] sm:$0xff] %v2947_v12 }
 0x134   :  { %v1618_v44 = vmul.f32 -1.442695, %v1246_v2  ;;  %3177 = vst [vmem:[#allocation16_spill] sm:$0xff] %v2941_v9  ;;  %2020 = vrcp.f32 %v1080_v60  ;;  %v1023_v52 = vadd.f32 %v2833_v15, %v610_v39  ;;  %v612_v16 = vpop.f32.mrb[15].mxu0  ;;  %v2944_v8 = vpop.f32.mrb[31].mxu1  ;;  %v1083_v39 = vadd.f32 1.0, %v2003_v45 }
 0x135   :  { %3178 = vst [vmem:[#allocation17_spill] sm:$0xff] %v2944_v8  ;;  %v2005_v36 = vpop.eup %2004  ;;  %2022 = vrcp.f32 %v1081_v63  ;;  %v1247_v18 = vadd.f32 %v2893_v22, %v612_v16  ;;  %v1418_v14 = vpop.permute.xlu1 %1417 }
 0x136   :  { %v1307_v49 = vadd.f32 1.0, %v2005_v36  ;;  %2024 = vpow2.f32 %v1618_v44  ;;  %v1603_v55 = vmul.f32 -1.442695, %v1023_v52  ;;  %v2007_v13 = vpop.eup %2006 }
 0x137   :  { %2026 = vrcp.f32 %v1082_v1  ;;  %v1619_v31 = vmul.f32 -1.442695, %v1247_v18  ;;  %v616_v60 = vpop.f32.mrb[16].mxu0  ;;  %v1782_v2 = vpop.f32.mrb[32].mxu1 }
 0x138   :  { %v2009_v15 = vpop.eup %2008  ;;  %2028 = vrcp.f32 %v1307_v49  ;;  %v912_v9 = vadd.f32 %v616_v60, %v2851_v27  ;;  %v618_v63 = vpop.f32.mrb[17].mxu0 }
 0x139   :  { %v729_v53 = vpop.f32.mrb[33].mxu1  ;;  %v2011_v8 = vpop.eup %2010  ;;  %2030 = vpow2.f32 %v1602_v43  ;;  %v1385_v22 = vmul.f32 %v2009_v15, %v1782_v2  ;;  %v1168_v44 = vadd.f32 %v618_v63, %v2853_v62 }
 0x13a   :  { %v1384_v52 = vmul.f32 %v2007_v13, %v729_v53  ;;  %v2013_v16 = vpop.eup %2012  ;;  %v1308_v36 = vadd.f32 1.0, %v2011_v8  ;;  %2032 = vpow2.f32 %v1603_v55  ;;  %v1426_v15 = vpop.permute.xlu1 %1425 }
 0x13b   :  { %v2015_v1 = vpop.eup %2014  ;;  %2034 = vpow2.f32 %v1619_v31  ;;  %v1248_v18 = vadd.f32 %v2891_v54, %v1168_v44  ;;  %v622_v49 = vpop.f32.mrb[18].mxu0  ;;  %v1084_v2 = vadd.f32 1.0, %v2013_v16 }
 0x13c   :  { %v1400_v45 = vadd.f32 %v1384_v52, %v2897_v58  ;;  %v1785_v56 = vpop.f32.mrb[34].mxu1  ;;  %v2017_v27 = vpop.eup %2016  ;;  %2036 = vrcp.f32 %v1308_v36  ;;  %v913_v13 = vadd.f32 %v622_v49, %v2857_v10  ;;  %v1401_v58 = vadd.f32 %v2895_v57, %v1385_v22 }
 0x13d   :  { %v624_v60 = vpop.f32.mrb[19].mxu0  ;;  %v739_v12 = vpop.f32.mrb[35].mxu1  ;;  %2038 = vrcp.f32 %v1083_v39  ;;  %v1620_v62 = vmul.f32 -1.442695, %v1248_v18  ;;  %v1085_v44 = vadd.f32 1.0, %v2015_v1  ;;  %v1024_v52 = vadd.f32 %v2843_v20, %v912_v9 }
 0x13e   :  { %v2019_v43 = vpop.eup %2018  ;;  %v1480_v31 = vadd.f32 %v1418_v14, %v1400_v45  ;;  %v1422_v54 = vpop.permute.xlu0 %1421  ;;  %v1169_v63 = vadd.f32 %v624_v60, %v2859_v30  ;;  %v1386_v39 = vmul.f32 %v2017_v27, %v739_v12 }
 0x13f   :  { %v2954_v8 = vpop.eup %2020  ;;  %v1309_v55 = vadd.f32 1.0, %v2019_v43  ;;  %2040 = vpow2.f32 %v1620_v62  ;;  %v628_v16 = vpop.f32.mrb[20].mxu0  ;;  %v1481_v57 = vadd.f32 %v1422_v54, %v1401_v58  ;;  %v1604_v27 = vmul.f32 -1.442695, %v1024_v52 }
 0x140   :  { %v2958_v53 = vpop.eup %2022  ;;  %v2961_v36 = vpop.f32.mrb[36].mxu1  ;;  %v1249_v14 = vadd.f32 %v2905_v7, %v1169_v63  ;;  %v1402_v22 = vadd.f32 %v1386_v39, %v2901_v4  ;;  %v914_v9 = vadd.f32 %v628_v16, %v2861_v21 }
 0x141   :  { %v2025_v10 = vpop.eup %2024  ;;  %2042 = vrcp.f32 %v1309_v55  ;;  %v630_v18 = vpop.f32.mrb[21].mxu0 }
 0x142   :  { %v749_v45 = vpop.f32.mrb[37].mxu1  ;;  %v2964_v49 = vpop.eup %2026  ;;  %2044 = vrcp.f32 %v1084_v2  ;;  %v1310_v30 = vadd.f32 1.0, %v2025_v10  ;;  %v1621_v20 = vmul.f32 -1.442695, %v1249_v14  ;;  %v1170_v7 = vadd.f32 %v630_v18, %v2865_v32 }
 0x143   :  { %v2029_v1 = vpop.eup %2028  ;;  %2046 = vtanh.f32 %v1480_v31  ;;  %v634_v43 = vpop.f32.mrb[22].mxu0  ;;  %v1025_v2 = vadd.f32 %v2837_v17, %v913_v13  ;;  %v1482_v58 = vadd.f32 %v1426_v15, %v1402_v22  ;;  %v1512_v32 = vmul.f32 %v2954_v8, %v2565_v24 }
 0x144   :  { %v2031_v12 = vpop.eup %2030  ;;  %2048 = vrcp.f32 %v1085_v44  ;;  %v1387_v60 = vmul.f32 %v2029_v1, %v1785_v56  ;;  %v2969_v62 = vpop.f32.mrb[38].mxu1  ;;  %v2973_v4 = vadd.f32 %v634_v43, %v2867_v37  ;;  %v1250_v17 = vadd.f32 %v2903_v6, %v1170_v7 }
 0x145   :  { %v2033_v55 = vpop.eup %2032  ;;  %2050 = vrcp.f32 %v1310_v30  ;;  %v636_v31 = vpop.f32.mrb[23].mxu0  ;;  %v1086_v37 = vadd.f32 1.0, %v2031_v12  ;;  %v2989_v24 = vmul.f32 %v2958_v53, %v2592_v29  ;;  %v1605_v14 = vmul.f32 -1.442695, %v1025_v2 }
 0x146   :  { %v2975_v54 = vpop.f32.mrb[39].mxu1  ;;  %v2035_v21 = vpop.eup %2034  ;;  %2052 = vtanh.f32 %v1481_v57  ;;  %v1403_v56 = vadd.f32 %v2899_v0, %v1387_v60  ;;  %v1171_v16 = vadd.f32 %v636_v31, %v2869_v38  ;;  %v1528_v0 = vsub.f32 1.0, %v2954_v8 }
 0x147   :  { %v2037_v63 = vpop.eup %2036  ;;  %v1311_v44 = vadd.f32 1.0, %v2035_v21  ;;  %2054 = vpow2.f32 %v1621_v20  ;;  %v1430_v52 = vpop.permute.xlu1 %1429  ;;  %v1087_v57 = vadd.f32 1.0, %v2033_v55  ;;  %v1529_v20 = vsub.f32 1.0, %v2958_v53 }
 0x148   :  { %v2981_v13 = vpop.eup %2038  ;;  %2056 = vpow2.f32 %v1604_v27  ;;  %v1483_v39 = vadd.f32 %v1430_v52, %v1403_v56  ;;  %v640_v10 = vpop.f32.mrb[24].mxu0  ;;  %v1251_v22 = vadd.f32 %v2918_v26, %v1171_v16  ;;  %v1388_v38 = vmul.f32 %v2037_v63, %v749_v45 }
 0x149   :  { %v2984_v15 = vpop.f32.mrb[40].mxu1  ;;  %2058 = vrcp.f32 %v1311_v44  ;;  %v642_v18 = vpop.f32.mrb[25].mxu0  ;;  %v1622_v8 = vmul.f32 -1.442695, %v1250_v17  ;;  %v916_v12 = vadd.f32 %v640_v10, %v2871_v41  ;;  %v1026_v45 = vadd.f32 %v2847_v25, %v914_v9 }
 0x14a   :  { %v2991_v6 = vpop.f32.mrb[41].mxu1  ;;  %v2041_v30 = vpop.eup %2040  ;;  %2060 = vtanh.f32 %v1482_v58  ;;  %v1404_v7 = vadd.f32 %v1388_v38, %v2909_v33  ;;  %v1623_v53 = vmul.f32 -1.442695, %v1251_v22  ;;  %v1172_v2 = vadd.f32 %v642_v18, %v2873_v42 }
 0x14b   :  { %v2043_v1 = vpop.eup %2042  ;;  %2062 = vtanh.f32 %v1483_v39  ;;  %v1312_v27 = vadd.f32 1.0, %v2041_v30  ;;  %v646_v43 = vpop.f32.mrb[26].mxu0  ;;  %v1530_v63 = vsub.f32 1.0, %v2964_v49  ;;  %v1028_v22 = vadd.f32 %v2855_v28, %v916_v12 }
 0x14c   :  { %v2996_v29 = vpop.eup %2044  ;;  %2064 = vrcp.f32 %v1086_v37  ;;  %v1389_v60 = vmul.f32 %v2043_v1, %v2961_v36  ;;  %v3000_v55 = vpop.f32.mrb[42].mxu1  ;;  %v1514_v36 = vmul.f32 %v2964_v49, %v2619_v35  ;;  %v1252_v42 = vadd.f32 %v2916_v3, %v1172_v2 }
 0x14d   :  { %v2047_v26 = vpop.eup %2046  ;;  %2066 = vpow2.f32 %v1605_v14  ;;  %v648_v31 = vpop.f32.mrb[27].mxu0  ;;  %v917_v44 = vadd.f32 %v646_v43, %v2875_v46  ;;  %v1027_v35 = vadd.f32 %v2841_v19, %v2973_v4  ;;  %v1531_v49 = vsub.f32 1.0, %v2981_v13 }
 0x14e   :  { %v3004_v41 = vpop.f32.mrb[43].mxu1  ;;  %v3006_v21 = vpop.eup %2048  ;;  %2068 = vrcp.f32 %v1087_v57  ;;  %v1544_v33 = vmul.f32 %v2047_v26, %v1528_v0  ;;  %v1405_v58 = vadd.f32 %v2907_v34, %v1389_v60  ;;  %v1606_v0 = vmul.f32 -1.442695, %v1026_v45 }
 0x14f   :  { %v2051_v56 = vpop.eup %2050  ;;  %2070 = vpow2.f32 %v1622_v8  ;;  %v1438_v25 = vpop.permute.xlu1 %1437  ;;  %v1624_v38 = vmul.f32 -1.442695, %v1252_v42  ;;  %v1608_v2 = vmul.f32 -1.442695, %v1028_v22  ;;  %v3183_v22 = vld [vmem:[#allocation4_spill] sm:$0xff] }
 0x150   :  { %v1434_v9 = vpop.permute.xlu0 %1433  ;;  %v2053_v52 = vpop.eup %2052  ;;  %2072 = vrcp.f32 %v1312_v27  ;;  %v1560_v17 = vadd.f32 %v1544_v33, %v1512_v32  ;;  %v1485_v37 = vadd.f32 %v1438_v25, %v1405_v58  ;;  %v1173_v32 = vadd.f32 %v648_v31, %v2877_v48 }
 0x151   :  { %v652_v39 = vpop.f32.mrb[28].mxu0  ;;  %v3016_v16 = vpop.f32.mrb[44].mxu1  ;;  %v1545_v10 = vmul.f32 %v2053_v52, %v1529_v20  ;;  %2074 = vpow2.f32 %v1623_v53  ;;  %v1484_v4 = vadd.f32 %v1434_v9, %v1404_v7  ;;  %v1390_v18 = vmul.f32 %v2051_v56, %v2975_v54  ;;  %v3180_v52 = vld [vmem:[#allocation9_spill] sm:$0xff] }
 0x152   :  { %v2055_v34 = vpop.eup %2054  ;;  %v654_v14 = vpop.f32.mrb[29].mxu0  ;;  %1576 = vst [vmem:[%s3161_s5] sm:$0xff] %v1560_v17  ;;  %2076 = vtanh.f32 %v1485_v37  ;;  %v1607_v20 = vmul.f32 -1.442695, %v1027_v35  ;;  %v1253_v27 = vadd.f32 %v2933_v47, %v1173_v32  ;;  %v1515_v54 = vmul.f32 %v2981_v13, %v2646_v40  ;;  %v3182_v32 = vld [vmem:[#allocation18_spill] sm:$0xff] }
 0x153   :  { %v3019_v3 = vpop.f32.mrb[45].mxu1  ;;  %v3021_v46 = vpop.eup %2056  ;;  %v1313_v19 = vadd.f32 1.0, %v2055_v34  ;;  %v1561_v57 = vadd.f32 %v1545_v10, %v2989_v24  ;;  %v1406_v24 = vadd.f32 %v1390_v18, %v2914_v5  ;;  %v1029_v56 = vadd.f32 %v2845_v23, %v917_v44 }
 0x154   :  { %v2059_v30 = vpop.eup %2058  ;;  %v658_v60 = vpop.f32.mrb[30].mxu0  ;;  %v1625_v45 = vmul.f32 -1.442695, %v1253_v27  ;;  %v3184_v27 = vld [vmem:[#allocation10_spill] sm:$0xff] }
 0x155   :  { %v2061_v1 = vpop.eup %2060  ;;  %2078 = vrcp.f32 %v1313_v19  ;;  %v1391_v8 = vmul.f32 %v2059_v30, %v2969_v62  ;;  %v3032_v7 = vpop.f32.mrb[46].mxu1  ;;  %1577 = vst [vmem:[%s3161_s5 + $0x8] sm:$0xff] %v1561_v57  ;;  %v3057_v42 = vadd.f32 %v658_v60, %v2887_v11 }
 0x156   :  { %v2063_v48 = vpop.eup %2062  ;;  %v1546_v28 = vmul.f32 %v2061_v1, %v1530_v63  ;;  %2080 = vpow2.f32 %v1606_v0  ;;  %v660_v12 = vpop.f32.mrb[31].mxu0 }
 0x157   :  { %v3040_v43 = vpop.f32.mrb[47].mxu1  ;;  %v3042_v62 = vpop.eup %2064  ;;  %v1547_v47 = vmul.f32 %v2063_v48, %v1531_v49  ;;  %2082 = vtanh.f32 %v1484_v4  ;;  %v1407_v26 = vadd.f32 %v2911_v61, %v1391_v8  ;;  %v918_v61 = vadd.f32 %v652_v39, %v2881_v50  ;;  %v3181_v39 = vld [vmem:[#allocation5_spill] sm:$0xff]  ;;  %v3185_v48 = vld [vmem:[#allocation11_spill] sm:$0xff] }
 0x158   :  { %v2067_v53 = vpop.eup %2066  ;;  %v1562_v40 = vadd.f32 %v1546_v28, %v1514_v36  ;;  %v1446_v13 = vpop.permute.xlu1 %1445  ;;  %2084 = vpow2.f32 %v1624_v38  ;;  %v1174_v36 = vadd.f32 %v654_v14, %v2885_v51  ;;  %v1175_v17 = vadd.f32 %v660_v12, %v3180_v52 }
 0x159   :  { %v3045_v31 = vpop.eup %2068  ;;  %v1563_v33 = vadd.f32 %v1547_v47, %v1515_v54  ;;  %2086 = vpow2.f32 %v1607_v20  ;;  %v1487_v5 = vadd.f32 %v1446_v13, %v1407_v26  ;;  %v1442_v9 = vpop.permute.xlu0 %1441  ;;  %v1533_v51 = vsub.f32 1.0, %v3006_v21 }
 0x15a   :  { %v2071_v58 = vpop.eup %2070  ;;  %1578 = vst [vmem:[%s3161_s5 + $0x10] sm:$0xff] %v1562_v40  ;;  %2088 = vpow2.f32 %v1625_v45  ;;  %v1486_v23 = vadd.f32 %v1442_v9, %v1406_v24  ;;  %v1254_v50 = vadd.f32 %v2931_v59, %v1174_v36  ;;  %v1517_v34 = vmul.f32 %v3006_v21, %v3181_v39 }
 0x15b   :  { %v2073_v63 = vpop.eup %2072  ;;  %1579 = vst [vmem:[%s3161_s5 + $0x18] sm:$0xff] %v1563_v33  ;;  %v1314_v25 = vadd.f32 1.0, %v2071_v58  ;;  %2090 = vtanh.f32 %v1487_v5  ;;  %v1089_v10 = vadd.f32 1.0, %v2067_v53  ;;  %v1532_v49 = vsub.f32 1.0, %v2996_v29  ;;  %v3187_v33 = vld [vmem:[#allocation6_spill] sm:$0xff] }
 0x15c   :  { %v2075_v35 = vpop.eup %2074  ;;  %2092 = vpow2.f32 %v1608_v2  ;;  %v1609_v14 = vmul.f32 -1.442695, %v1029_v56  ;;  %v1626_v19 = vmul.f32 -1.442695, %v1254_v50  ;;  %v1255_v59 = vadd.f32 %v3182_v32, %v1175_v17  ;;  %v1454_v47 = vpop.permute.xlu1 %1453 }
 0x15d   :  { %2094 = vrcp.f32 %v1314_v25  ;;  %v1315_v44 = vadd.f32 1.0, %v2075_v35  ;;  %v2077_v37 = vpop.eup %2076  ;;  %v1392_v30 = vmul.f32 %v2073_v63, %v2991_v6  ;;  %v1516_v21 = vmul.f32 %v2996_v29, %v3183_v22  ;;  %v3186_v6 = vld [vmem:[#allocation8_spill] sm:$0xff]  ;;  %v1450_v40 = vpop.permute.xlu0 %1449 }
 0x15e   :  { %v1549_v0 = vmul.f32 %v2077_v37, %v1533_v51  ;;  %v1088_v38 = vadd.f32 1.0, %v3021_v46  ;;  %v1030_v24 = vadd.f32 %v3186_v6, %v918_v61  ;;  %v1535_v46 = vsub.f32 1.0, %v3045_v31  ;;  %v3189_v37 = vld [vmem:[#allocation13_spill] sm:$0xff] }
 0x15f   :  { %v2079_v11 = vpop.eup %2078  ;;  %2096 = vrcp.f32 %v1315_v44  ;;  %v1408_v54 = vadd.f32 %v1392_v30, %v3185_v48  ;;  %v1627_v26 = vmul.f32 -1.442695, %v1255_v59  ;;  %v1519_v5 = vmul.f32 %v3045_v31, %v3187_v33  ;;  %v3188_v31 = vld [vmem:[#allocation7_spill] sm:$0xff] }
 0x160   :  { %v2081_v4 = vpop.eup %2080  ;;  %2098 = vtanh.f32 %v1486_v23  ;;  %v1393_v18 = vmul.f32 %v2079_v11, %v2984_v15  ;;  %v1565_v1 = vadd.f32 %v1549_v0, %v1517_v34  ;;  %v1610_v36 = vmul.f32 -1.442695, %v1030_v24 }
 0x161   :  { %v2083_v57 = vpop.eup %2082  ;;  %2100 = vpow2.f32 %v1626_v19  ;;  %v1488_v56 = vadd.f32 %v1450_v40, %v1408_v54  ;;  %v1090_v17 = vadd.f32 1.0, %v2081_v4  ;;  %v1534_v35 = vsub.f32 1.0, %v3042_v62  ;;  %v1458_v32 = vpop.permute.xlu0 %1457 }
 0x162   :  { %v2085_v20 = vpop.eup %2084  ;;  %v1548_v8 = vmul.f32 %v2083_v57, %v1532_v49  ;;  %v1409_v60 = vadd.f32 %v3184_v27, %v1393_v18  ;;  %1581 = vst [vmem:[%s3161_s5 + $0x28] sm:$0xff] %v1565_v1  ;;  %2102 = vpow2.f32 %v1609_v14  ;;  %v1031_v23 = vadd.f32 %v3188_v31, %v3057_v42  ;;  %v3190_v49 = vld [vmem:[#allocation12_spill] sm:$0xff]  ;;  %v1462_v14 = vpop.permute.xlu1 %1461  ;;  %v3191_v27 = vld [vmem:[#allocation15_spill] sm:$0xff] }
 0x163   :  { %v2087_v28 = vpop.eup %2086  ;;  %v1316_v15 = vadd.f32 1.0, %v2085_v20  ;;  %2104 = vrcp.f32 %v1089_v10 }
 0x164   :  { %v2089_v29 = vpop.eup %2088  ;;  %v1564_v12 = vadd.f32 %v1548_v8, %v1516_v21  ;;  %v1489_v13 = vadd.f32 %v1454_v47, %v1409_v60  ;;  %v1091_v63 = vadd.f32 1.0, %v2087_v28  ;;  %v2151_v28 = vld [vmem:[%s3160_s1 + $0x48] sm:$0xff] }
 0x165   :  { %v2091_v45 = vpop.eup %2090  ;;  %2106 = vrcp.f32 %v1316_v15  ;;  %v1317_v53 = vadd.f32 1.0, %v2089_v29  ;;  %v1466_v24 = vpop.permute.xlu0 %1465 }
 0x166   :  { %v2093_v2 = vpop.eup %2092  ;;  %2108 = vrcp.f32 %v1088_v38  ;;  %1580 = vst [vmem:[%s3161_s5 + $0x20] sm:$0xff] %v1564_v12  ;;  %v1551_v58 = vmul.f32 %v2091_v45, %v1535_v46  ;;  %v3192_v46 = vld [vmem:[#allocation14_spill] sm:$0xff] }
 0x167   :  { %v2095_v61 = vpop.eup %2094  ;;  %2110 = vrcp.f32 %v1317_v53  ;;  %v1092_v51 = vadd.f32 1.0, %v2093_v2  ;;  %v1470_v53 = vpop.permute.xlu1 %1469 }
 0x168   :  { %v1567_v25 = vadd.f32 %v1551_v58, %v1519_v5  ;;  %2112 = vpow2.f32 %v1627_v26  ;;  %v1394_v9 = vmul.f32 %v2095_v61, %v3004_v41  ;;  %v2150_v41 = vld [vmem:[%s3160_s1 + $0x30] sm:$0xff] }
 0x169   :  { %v2097_v52 = vpop.eup %2096  ;;  %2114 = vtanh.f32 %v1489_v13  ;;  %v1518_v34 = vmul.f32 %v2150_v41, %v3042_v62 }
 0x16a   :  { %v2099_v50 = vpop.eup %2098  ;;  %1583 = vst [vmem:[%s3161_s5 + $0x38] sm:$0xff] %v1567_v25  ;;  %2116 = vtanh.f32 %v1488_v56  ;;  %v1395_v44 = vmul.f32 %v2097_v52, %v3000_v55  ;;  %v1410_v39 = vadd.f32 %v1394_v9, %v3189_v37  ;;  %v1611_v55 = vmul.f32 -1.442695, %v1031_v23  ;;  %v2154_v37 = vld [vmem:[%s3160_s1 + $0x50] sm:$0xff] }
 0x16b   :  { %v1550_v10 = vmul.f32 %v2099_v50, %v1534_v35  ;;  %2118 = vpow2.f32 %v1610_v36  ;;  %v2101_v42 = vpop.eup %2100  ;;  %v2153_v35 = vld [vmem:[%s3160_s1 + $0x58] sm:$0xff] }
 0x16c   :  { %2120 = vrcp.f32 %v1091_v63  ;;  %v1411_v11 = vadd.f32 %v3190_v49, %v1395_v44  ;;  %v2103_v0 = vpop.eup %2102  ;;  %v1318_v4 = vadd.f32 1.0, %v2101_v42  ;;  %v1490_v30 = vadd.f32 %v1458_v32, %v1410_v39 }
 0x16d   :  { %2122 = vrcp.f32 %v1090_v17  ;;  %v1566_v19 = vadd.f32 %v1550_v10, %v1518_v34  ;;  %v2105_v59 = vpop.eup %2104  ;;  %v1093_v22 = vadd.f32 1.0, %v2103_v0 }
 0x16e   :  { %2124 = vrcp.f32 %v1092_v51  ;;  %v1491_v18 = vadd.f32 %v1462_v14, %v1411_v11  ;;  %v1537_v20 = vsub.f32 1.0, %v2105_v59  ;;  %v1521_v15 = vmul.f32 %v2151_v28, %v2105_v59  ;;  %v3193_v51 = vld [vmem:[#allocation17_spill] sm:$0xff] }
 0x16f   :  { %v2107_v57 = vpop.eup %2106  ;;  %1582 = vst [vmem:[%s3161_s5 + $0x30] sm:$0xff] %v1566_v19  ;;  %2126 = vrcp.f32 %v1318_v4 }
 0x170   :  { %v2109_v62 = vpop.eup %2108  ;;  %2128 = vtanh.f32 %v1491_v18  ;;  %v1396_v21 = vmul.f32 %v2107_v57, %v3019_v3  ;;  %v3194_v57 = vld [vmem:[#allocation16_spill] sm:$0xff] }
 0x171   :  { %v2111_v38 = vpop.eup %2110  ;;  %2130 = vpow2.f32 %v1611_v55  ;;  %v1536_v54 = vsub.f32 1.0, %v2109_v62  ;;  %v2155_v55 = vld [vmem:[%s3160_s1 + $0x60] sm:$0xff] }
 0x172   :  { %v2113_v1 = vpop.eup %2112  ;;  %2132 = vtanh.f32 %v1490_v30  ;;  %v1397_v8 = vmul.f32 %v2111_v38, %v3016_v16  ;;  %v1412_v60 = vadd.f32 %v1396_v21, %v3191_v27  ;;  %v2152_v16 = vld [vmem:[%s3160_s1 + $0x40] sm:$0xff]  ;;  %v1478_v21 = vpop.permute.xlu1 %1477 }
 0x173   :  { %v2115_v48 = vpop.eup %2114  ;;  %v1319_v6 = vadd.f32 1.0, %v2113_v1  ;;  %2134 = vrcp.f32 %v1093_v22  ;;  %v1520_v45 = vmul.f32 %v2152_v16, %v2109_v62 }
 0x174   :  { %v2117_v29 = vpop.eup %2116  ;;  %v1553_v3 = vmul.f32 %v2115_v48, %v1537_v20  ;;  %v1413_v12 = vadd.f32 %v3192_v46, %v1397_v8  ;;  %v1492_v47 = vadd.f32 %v1466_v24, %v1412_v60  ;;  %v2158_v46 = vld [vmem:[%s3160_s1 + $0x78] sm:$0xff] }
 0x175   :  { %v2119_v26 = vpop.eup %2118  ;;  %2136 = vrcp.f32 %v1319_v6  ;;  %v1552_v40 = vmul.f32 %v2117_v29, %v1536_v54  ;;  %v2157_v54 = vld [vmem:[%s3160_s1 + $0x70] sm:$0xff] }
 0x176   :  { %v2121_v13 = vpop.eup %2120  ;;  %v1569_v2 = vadd.f32 %v1553_v3, %v1521_v15  ;;  %v1493_v33 = vadd.f32 %v1470_v53, %v1413_v12  ;;  %2138 = vtanh.f32 %v1492_v47  ;;  %v1094_v61 = vadd.f32 1.0, %v2119_v26 }
 0x177   :  { %v2123_v5 = vpop.eup %2122  ;;  %v1568_v58 = vadd.f32 %v1552_v40, %v1520_v45  ;;  %v1539_v63 = vsub.f32 1.0, %v2121_v13  ;;  %v1523_v31 = vmul.f32 %v2153_v35, %v2121_v13 }
 0x178   :  { %v2125_v56 = vpop.eup %2124  ;;  %1585 = vst [vmem:[%s3161_s5 + $0x48] sm:$0xff] %v1569_v2  ;;  %2140 = vtanh.f32 %v1493_v33  ;;  %v1538_v17 = vsub.f32 1.0, %v2123_v5  ;;  %v1522_v39 = vmul.f32 %v2154_v37, %v2123_v5 }
 0x179   :  { %v2127_v36 = vpop.eup %2126  ;;  %1584 = vst [vmem:[%s3161_s5 + $0x40] sm:$0xff] %v1568_v58  ;;  %2142 = vrcp.f32 %v1094_v61  ;;  %v1540_v0 = vsub.f32 1.0, %v2125_v56  ;;  %v1524_v32 = vmul.f32 %v2155_v55, %v2125_v56 }
 0x17a   :  { %v2129_v25 = vpop.eup %2128  ;;  %v1398_v9 = vmul.f32 %v2127_v36, %v3040_v43  ;;  %v1474_v43 = vpop.permute.xlu0 %1473 }
 0x17b   :  { %v2131_v52 = vpop.eup %2130  ;;  %v1555_v23 = vmul.f32 %v2129_v25, %v1539_v63 }
 0x17c   :  { %v2133_v50 = vpop.eup %2132  ;;  %v1414_v44 = vadd.f32 %v1398_v9, %v3193_v51  ;;  %v1095_v42 = vadd.f32 1.0, %v2131_v52 }
 0x17d   :  { %v1571_v41 = vadd.f32 %v1555_v23, %v1523_v31  ;;  %v1554_v34 = vmul.f32 %v2133_v50, %v1538_v17  ;;  %v2135_v10 = vpop.eup %2134 }
 0x17e   :  { %v1494_v49 = vadd.f32 %v1474_v43, %v1414_v44  ;;  %v1541_v59 = vsub.f32 1.0, %v2135_v10 }
 0x17f   :  { %v2137_v11 = vpop.eup %2136  ;;  %1587 = vst [vmem:[%s3161_s5 + $0x58] sm:$0xff] %v1571_v41  ;;  %v1570_v14 = vadd.f32 %v1554_v34, %v1522_v39 }
 0x180   :  { %v2139_v19 = vpop.eup %2138  ;;  %v1399_v4 = vmul.f32 %v2137_v11, %v3032_v7  ;;  %2144 = vtanh.f32 %v1494_v49  ;;  %v2156_v7 = vld [vmem:[%s3160_s1 + $0x68] sm:$0xff] }
 0x181   :  { %1586 = vst [vmem:[%s3161_s5 + $0x50] sm:$0xff] %v1570_v14  ;;  %v1556_v18 = vmul.f32 %v2139_v19, %v1540_v0  ;;  %2146 = vrcp.f32 %v1095_v42  ;;  %v1525_v22 = vmul.f32 %v2156_v7, %v2135_v10 }
 0x182   :  { %v2141_v30 = vpop.eup %2140  ;;  %v1415_v62 = vadd.f32 %v3194_v57, %v1399_v4 }
 0x183   :  { %v1557_v38 = vmul.f32 %v2141_v30, %v1541_v59  ;;  %v1572_v1 = vadd.f32 %v1556_v18, %v1524_v32  ;;  %v2143_v27 = vpop.eup %2142 }
 0x184   :  { %v1495_v20 = vadd.f32 %v1478_v21, %v1415_v62  ;;  %v1542_v60 = vsub.f32 1.0, %v2143_v27  ;;  %v1526_v28 = vmul.f32 %v2157_v54, %v2143_v27 }
 0x185   :  { %v1573_v8 = vadd.f32 %v1557_v38, %v1525_v22  ;;  %1588 = vst [vmem:[%s3161_s5 + $0x60] sm:$0xff] %v1572_v1 }
 0x186   :  { %2148 = vtanh.f32 %v1495_v20 }
 0x187   :  { %1589 = vst [vmem:[%s3161_s5 + $0x68] sm:$0xff] %v1573_v8 }
 0x18a   :  { %v2145_v48 = vpop.eup %2144 }
 0x18b   :  { %v1558_v15 = vmul.f32 %v2145_v48, %v1542_v60  ;;  %v2147_v6 = vpop.eup %2146 }
 0x18c   :  { %v1543_v29 = vsub.f32 1.0, %v2147_v6  ;;  %v1527_v12 = vmul.f32 %v2158_v46, %v2147_v6 }
 0x18d   :  { %v1574_v24 = vadd.f32 %v1558_v15, %v1526_v28 }
 0x18f   :  { %1590 = vst [vmem:[%s3161_s5 + $0x70] sm:$0xff] %v1574_v24 }
 0x190   :  { %v2149_v3 = vpop.eup %2148 }
 0x191   :  { %v1559_v47 = vmul.f32 %v2149_v3, %v1543_v29 }
 0x193   :  { %v1575_v26 = vadd.f32 %v1559_v47, %v1527_v12 }
 0x195   :  { %1591 = vst [vmem:[%s3161_s5 + $0x78] sm:$0xff] %v1575_v26 }

</bundles_post_ra>
